<compile_context>
chip_gen: v6e
topology: v6e:2x2x1
jax: 0.10.0
libtpu: 0.0.40
codegen_flags: <defaults>
</compile_context>

<pallas_src>
import functools

import jax
import jax.numpy as jnp
from jax.experimental import pallas as pl
from jax.experimental.pallas import tpu as pltpu


def _round_up(x, m):
    return ((x + m - 1) // m) * m


def _pick_tile(dim, preferred, unit):
    """Largest tile <= preferred that divides dim (dim is a multiple of unit)."""
    t = min(preferred, dim)
    t = max((t // unit) * unit, unit)
    while dim % t != 0:
        t -= unit
    return t


# ---------------------------------------------------------------------------
# Kernel 1: tiled matmul + bias, bf16 operands, f32 accumulate.
# Used for (a) the batched input projection over all T and (b) the batched fc.
# K is kept whole per block (fine for typical E/H); add a K axis if K is huge.
# ---------------------------------------------------------------------------
def _matmul_bias_kernel(x_ref, w_ref, b_ref, o_ref):
    acc = jnp.dot(x_ref[...], w_ref[...], preferred_element_type=jnp.float32)
    o_ref[...] = (acc + b_ref[...]).astype(o_ref.dtype)


def matmul_bias_pallas(x, w, b, *, out_dtype=jnp.float32, tm_max=256, tn_max=512):
    """x: (M, K) bf16, w: (K, N) bf16, b: (1, N) f32.  M%8==0, K%128==0, N%128==0."""
    M, K = x.shape
    _, N = w.shape
    tm = _pick_tile(M, tm_max, 8)
    tn = _pick_tile(N, tn_max, 128)
    return pl.pallas_call(
        _matmul_bias_kernel,
        out_shape=jax.ShapeDtypeStruct((M, N), out_dtype),
        grid_spec=pltpu.PrefetchScalarGridSpec(
            num_scalar_prefetch=0,
            grid=(M // tm, N // tn),
            in_specs=[
                pl.BlockSpec((tm, K), lambda i, j: (i, 0)),
                pl.BlockSpec((K, tn), lambda i, j: (0, j)),
                pl.BlockSpec((1, tn), lambda i, j: (0, j)),
            ],
            out_specs=pl.BlockSpec((tm, tn), lambda i, j: (i, j)),
        ),
        # 'parallel' on both axes lets v7x's 2 TensorCores split the batched FC.
        compiler_params=pltpu.CompilerParams(
            dimension_semantics=("parallel", "parallel")),
    )(x, w, b)


# ---------------------------------------------------------------------------
# Kernel 2: the serial LSTM recurrence.  Single pallas_call, fori_loop over T.
#   xg_ref   : (T, Bp, 4Hp) f32  precomputed x@Wx + (b_ih+b_hh), gate-padded
#   wh_ref   : (Hp, 4Hp)    bf16 hidden->gates weights (transposed, padded)
#   hout_ref : (T, Bp, Hp)  bf16 hidden states for every step (fed to the FC)
# ---------------------------------------------------------------------------
def _lstm_recurrence_kernel(xg_ref, wh_ref, hout_ref, *, seq_len, hidden_pad):
    Hp = hidden_pad
    Bp = xg_ref.shape[1]

    def step(t, carry):
        h, c = carry  # f32 (Bp, Hp) — state kept in f32 to avoid drift over T
        gates = xg_ref[t] + jnp.dot(h.astype(jnp.bfloat16), wh_ref[...],
                                    preferred_element_type=jnp.float32)
        # Gate blocks are each Hp (multiple of 128) wide -> lane-aligned slices.
        i_g = jax.nn.sigmoid(gates[:, 0 * Hp:1 * Hp])
        f_g = jax.nn.sigmoid(gates[:, 1 * Hp:2 * Hp])
        g_g = jnp.tanh(gates[:, 2 * Hp:3 * Hp])
        o_g = jax.nn.sigmoid(gates[:, 3 * Hp:4 * Hp])
        c_new = f_g * c + i_g * g_g
        h_new = o_g * jnp.tanh(c_new)
        hout_ref[t] = h_new.astype(hout_ref.dtype)
        return h_new, c_new

    h0 = jnp.zeros((Bp, Hp), jnp.float32)
    c0 = jnp.zeros((Bp, Hp), jnp.float32)
    jax.lax.fori_loop(0, seq_len, step, (h0, c0), unroll=seq_len <= 16)


def lstm_recurrence_pallas(xg, wh_bf16):
    """xg: (T, Bp, 4Hp) f32, wh: (Hp, 4Hp) bf16 -> (T, Bp, Hp) bf16."""
    T, Bp, G4 = xg.shape
    Hp = G4 // 4
    kernel = functools.partial(_lstm_recurrence_kernel, seq_len=T, hidden_pad=Hp)
    return pl.pallas_call(
        kernel,
        out_shape=jax.ShapeDtypeStruct((T, Bp, Hp), jnp.bfloat16),
        grid_spec=pltpu.PrefetchScalarGridSpec(
            num_scalar_prefetch=0,
            grid=(1,),  # whole recurrence in one kernel invocation (all-VMEM)
            in_specs=[
                pl.BlockSpec((T, Bp, G4), lambda i: (0, 0, 0)),
                pl.BlockSpec((Hp, G4), lambda i: (0, 0)),
            ],
            out_specs=pl.BlockSpec((T, Bp, Hp), lambda i: (0, 0, 0)),
        ),
        # Recurrence is inherently serial.
        # TODO(synk): for production shapes on v7x (64 MiB VMEM) set
        # vmem_limit_bytes and single-buffer (pl.Buffered(1)) the weight specs.
        compiler_params=pltpu.CompilerParams(
            dimension_semantics=("arbitrary",)),
    )(xg, wh_bf16)


# ---------------------------------------------------------------------------
# One-time weight preparation (outside the per-call hot path):
# gate-blockwise padding H->Hp, E->Ep, V->Vp, transposes for row-major x @ W,
# bias fusion (b_ih + b_hh), bf16 casts for MXU operands.
# ---------------------------------------------------------------------------
def prepare_decoder_params(raw, *, lane=128):
    E = raw["w_ih"].shape[1]
    H = raw["w_hh"].shape[1]
    V = raw["w_fc"].shape[0]
    Ep = _round_up(E, lane)
    Hp = _round_up(H, lane)
    Vp = _round_up(V, lane)

    def pad_gate_rows(w):  # (4H, X) -> (4Hp, X): pad each gate block H -> Hp
        x_dim = w.shape[1]
        w4 = w.reshape(4, H, x_dim)
        w4 = jnp.pad(w4, ((0, 0), (0, Hp - H), (0, 0)))
        return w4.reshape(4 * Hp, x_dim)

    wx = jnp.pad(pad_gate_rows(raw["w_ih"]).T, ((0, Ep - E), (0, 0)))  # (Ep, 4Hp)
    wh = jnp.pad(pad_gate_rows(raw["w_hh"]).T, ((0, Hp - H), (0, 0)))  # (Hp, 4Hp)

    b = (raw["b_ih"] + raw["b_hh"]).reshape(4, H)
    b = jnp.pad(b, ((0, 0), (0, Hp - H))).reshape(1, 4 * Hp)           # (1, 4Hp)

    wfc = jnp.pad(raw["w_fc"].T, ((0, Hp - H), (0, Vp - V)))           # (Hp, Vp)
    bfc = jnp.pad(raw["b_fc"], (0, Vp - V)).reshape(1, Vp)             # (1, Vp)

    emb = jnp.pad(raw["embedding"], ((0, 0), (0, Ep - E)))             # (V, Ep)

    return {
        "embedding": emb.astype(jnp.bfloat16),
        "wx": wx.astype(jnp.bfloat16),
        "wh": wh.astype(jnp.bfloat16),
        "b": b.astype(jnp.float32),
        "wfc": wfc.astype(jnp.bfloat16),
        "bfc": bfc.astype(jnp.float32),
        "dims": dict(E=E, H=H, V=V, Ep=Ep, Hp=Hp, Vp=Vp),
    }


def decoder_rnn_forward(prep, features, captions):
    """Matches DecoderRNN.forward.
    features: (B, embed_size) f32; captions: (B, T_cap) int32
    returns : (B, T_cap, vocab_size) f32   (T = 1 feature step + T_cap-1 tokens)
    """
    d = prep["dims"]
    E, V = d["E"], d["V"]
    Ep, Hp, Vp = d["Ep"], d["Hp"], d["Vp"]

    captions = captions[:, :-1]
    B = features.shape[0]
    T = 1 + captions.shape[1]
    Bp = _round_up(max(B, 1), 8)  # fill all 8 sublanes / MXU rows (v5e note)

    # Embedding lookup + feature concat (glue, plain XLA gather).
    embeds = jnp.take(prep["embedding"], captions, axis=0)          # (B, T-1, Ep) bf16
    feats = jnp.pad(features, ((0, 0), (0, Ep - E))).astype(jnp.bfloat16)
    x = jnp.concatenate([feats[:, None, :], embeds], axis=1)        # (B, T, Ep)
    x = jnp.pad(x, ((0, Bp - B), (0, 0), (0, 0)))                   # (Bp, T, Ep)
    x_tbe = jnp.transpose(x, (1, 0, 2))                             # (T, Bp, Ep)

    # 1) Input projection hoisted out of the recurrence (one big matmul).
    xg = matmul_bias_pallas(x_tbe.reshape(T * Bp, Ep), prep["wx"], prep["b"])
    xg = xg.reshape(T, Bp, 4 * Hp)                                  # f32

    # 2) Serial LSTM recurrence (single kernel, in-kernel fori_loop over T).
    h_all = lstm_recurrence_pallas(xg, prep["wh"])                  # (T, Bp, Hp) bf16

    # 3) FC decoupled from the time loop: batched over T*Bp, lane-dense over Vp.
    logits = matmul_bias_pallas(h_all.reshape(T * Bp, Hp), prep["wfc"], prep["bfc"])
    logits = logits.reshape(T, Bp, Vp)

    return jnp.transpose(logits, (1, 0, 2))[:B, :, :V]              # (B, T, V) f32


def _reference_forward(raw, features, captions):
    """Pure-JAX f32 reference for numerical check."""
    captions = captions[:, :-1]
    embeds = jnp.take(raw["embedding"], captions, axis=0)
    x = jnp.concatenate([features[:, None, :], embeds], axis=1)     # (B, T, E)
    B, _, _ = x.shape
    H = raw["w_hh"].shape[1]

    def step(carry, x_t):
        h, c = carry
        gates = (x_t @ raw["w_ih"].T + h @ raw["w_hh"].T
                 + raw["b_ih"] + raw["b_hh"])
        i = jax.nn.sigmoid(gates[:, 0 * H:1 * H])
        f = jax.nn.sigmoid(gates[:, 1 * H:2 * H])
        g = jnp.tanh(gates[:, 2 * H:3 * H])
        o = jax.nn.sigmoid(gates[:, 3 * H:4 * H])
        c = f * c + i * g
        h = o * jnp.tanh(c)
        return (h, c), h

    h0 = jnp.zeros((B, H), jnp.float32)
    c0 = jnp.zeros((B, H), jnp.float32)
    _, hs = jax.lax.scan(step, (h0, c0), jnp.transpose(x, (1, 0, 2)))
    hs = jnp.transpose(hs, (1, 0, 2))                               # (B, T, H)
    return hs @ raw["w_fc"].T + raw["b_fc"]


if __name__ == "__main__":
    embed_size = 32
    hidden_size = 32
    vocab_size = 48
    batch = 2
    cap_len = 9          # captions length -> T = 1 + (cap_len - 1) = 9

    key = jax.random.PRNGKey(0)
    ks = jax.random.split(key, 9)
    raw = {
        "embedding": jax.random.normal(ks[0], (vocab_size, embed_size), jnp.float32) * 0.1,
        "w_ih": jax.random.normal(ks[1], (4 * hidden_size, embed_size), jnp.float32) * 0.1,
        "w_hh": jax.random.normal(ks[2], (4 * hidden_size, hidden_size), jnp.float32) * 0.1,
        "b_ih": jax.random.normal(ks[3], (4 * hidden_size,), jnp.float32) * 0.1,
        "b_hh": jax.random.normal(ks[4], (4 * hidden_size,), jnp.float32) * 0.1,
        "w_fc": jax.random.normal(ks[5], (vocab_size, hidden_size), jnp.float32) * 0.1,
        "b_fc": jax.random.normal(ks[6], (vocab_size,), jnp.float32) * 0.1,
    }
    features = jax.random.normal(ks[7], (batch, embed_size), jnp.float32)
    captions = jax.random.randint(ks[8], (batch, cap_len), 0, vocab_size, jnp.int32)

    prep = prepare_decoder_params(raw)          # one-time weight prep (not per call)
    fwd = jax.jit(lambda f, c: decoder_rnn_forward(prep, f, c))

    out = jax.block_until_ready(fwd(features, captions))

    ref = _reference_forward(raw, features, captions)
    assert out.shape == (batch, cap_len, vocab_size), out.shape
    # bf16 MXU operands vs f32 reference -> loosened (but tight-for-bf16) tolerance.
    assert jnp.allclose(out, ref, atol=2e-2, rtol=2e-2), "mismatch vs reference"

    # TODO(synk): DecoderRNN.sample (greedy decode with data-dependent argmax
    # feedback into the embedding) is a host-driven loop and is not implemented
    # as a kernel; only forward() is covered. nn.LSTM dropout is a no-op for
    # num_layers=1 and is intentionally omitted.
    print("KERNEL_OK")
</pallas_src>

<mosaic_0001>
module attributes {stable_mosaic.version = 11 : i64} {
  func.func @_matmul_bias_kernel(%arg0: i32, %arg1: i32, %arg2: memref<72x128xbf16, #tpu.memory_space<vmem>>, %arg3: memref<128x512xbf16, #tpu.memory_space<vmem>>, %arg4: memref<1x512xf32, #tpu.memory_space<vmem>>, %arg5: memref<72x512xf32, #tpu.memory_space<vmem>>) attributes {dimension_semantics = [#tpu.dimension_semantics<parallel>, #tpu.dimension_semantics<parallel>], iteration_bounds = array<i64: 1, 1>, scalar_prefetch = 0 : i64, scratch_operands = 0 : i64, tpu.core_type = #tpu.core_type<tc>, window_params = [{transform_indices = @transform_0, window_bounds = array<i64: 72, 128>}, {transform_indices = @transform_1, window_bounds = array<i64: 128, 512>}, {transform_indices = @transform_2, window_bounds = array<i64: 1, 512>}, {transform_indices = @transform_3, window_bounds = array<i64: 72, 512>}]} {
    %c0 = arith.constant 0 : index
    %c0_0 = arith.constant 0 : index
    %0 = vector.load %arg2[%c0, %c0_0] : memref<72x128xbf16, #tpu.memory_space<vmem>>, vector<72x128xbf16>
    %c0_1 = arith.constant 0 : index
    %c0_2 = arith.constant 0 : index
    %1 = vector.load %arg3[%c0_1, %c0_2] : memref<128x512xbf16, #tpu.memory_space<vmem>>, vector<128x512xbf16>
    %cst = arith.constant dense<0.000000e+00> : vector<72x512xf32>
    %2 = tpu.matmul %0, %1, %cst {dimension_numbers = #tpu.dot_dimension_numbers<[1], [0], [0], [1], [0, 0, 1, 1], [], []>} : vector<72x128xbf16>, vector<128x512xbf16>, vector<72x512xf32> -> vector<72x512xf32>
    %c0_3 = arith.constant 0 : index
    %c0_4 = arith.constant 0 : index
    %3 = vector.load %arg4[%c0_3, %c0_4] : memref<1x512xf32, #tpu.memory_space<vmem>>, vector<1x512xf32>
    %4 = vector.broadcast %3 : vector<1x512xf32> to vector<72x512xf32>
    %5 = arith.addf %2, %4 : vector<72x512xf32>
    %c0_5 = arith.constant 0 : index
    %c0_6 = arith.constant 0 : index
    %6 = vector.load %arg5[%c0_5, %c0_6] : memref<72x512xf32, #tpu.memory_space<vmem>>, vector<72x512xf32>
    tpu.vector_store %arg5[%c0_5, %c0_6], %5 {strides = array<i32>} : memref<72x512xf32, #tpu.memory_space<vmem>>, vector<72x512xf32>,
    return
  }
  func.func @transform_0(%arg0: i32, %arg1: i32) -> (i32, i32) {
    %c0_i32 = arith.constant 0 : i32
    %c0_i32_0 = arith.constant 0 : i32
    return %arg0, %c0_i32 : i32, i32
  }
  func.func @transform_1(%arg0: i32, %arg1: i32) -> (i32, i32) {
    %c0_i32 = arith.constant 0 : i32
    %c0_i32_0 = arith.constant 0 : i32
    return %c0_i32, %arg1 : i32, i32
  }
  func.func @transform_2(%arg0: i32, %arg1: i32) -> (i32, i32) {
    %c0_i32 = arith.constant 0 : i32
    %c0_i32_0 = arith.constant 0 : i32
    return %c0_i32, %arg1 : i32, i32
  }
  func.func @transform_3(%arg0: i32, %arg1: i32) -> (i32, i32) {
    %c0_i32 = arith.constant 0 : i32
    return %arg0, %arg1 : i32, i32
  }
}

module attributes {stable_mosaic.version = 11 : i64} {
  func.func @_matmul_bias_kernel(%arg0: i32, %arg1: i32, %arg2: memref<72x128xbf16, #tpu.memory_space<vmem>>, %arg3: memref<128x128xbf16, #tpu.memory_space<vmem>>, %arg4: memref<1x128xf32, #tpu.memory_space<vmem>>, %arg5: memref<72x128xf32, #tpu.memory_space<vmem>>) attributes {dimension_semantics = [#tpu.dimension_semantics<parallel>, #tpu.dimension_semantics<parallel>], iteration_bounds = array<i64: 1, 1>, scalar_prefetch = 0 : i64, scratch_operands = 0 : i64, tpu.core_type = #tpu.core_type<tc>, window_params = [{transform_indices = @transform_0, window_bounds = array<i64: 72, 128>}, {transform_indices = @transform_1, window_bounds = array<i64: 128, 128>}, {transform_indices = @transform_2, window_bounds = array<i64: 1, 128>}, {transform_indices = @transform_3, window_bounds = array<i64: 72, 128>}]} {
    %c0 = arith.constant 0 : index
    %c0_0 = arith.constant 0 : index
    %0 = vector.load %arg2[%c0, %c0_0] : memref<72x128xbf16, #tpu.memory_space<vmem>>, vector<72x128xbf16>
    %c0_1 = arith.constant 0 : index
    %c0_2 = arith.constant 0 : index
    %1 = vector.load %arg3[%c0_1, %c0_2] : memref<128x128xbf16, #tpu.memory_space<vmem>>, vector<128x128xbf16>
    %cst = arith.constant dense<0.000000e+00> : vector<72x128xf32>
    %2 = tpu.matmul %0, %1, %cst {dimension_numbers = #tpu.dot_dimension_numbers<[1], [0], [0], [1], [0, 0, 1, 1], [], []>} : vector<72x128xbf16>, vector<128x128xbf16>, vector<72x128xf32> -> vector<72x128xf32>
    %c0_3 = arith.constant 0 : index
    %c0_4 = arith.constant 0 : index
    %3 = vector.load %arg4[%c0_3, %c0_4] : memref<1x128xf32, #tpu.memory_space<vmem>>, vector<1x128xf32>
    %4 = vector.broadcast %3 : vector<1x128xf32> to vector<72x128xf32>
    %5 = arith.addf %2, %4 : vector<72x128xf32>
    %c0_5 = arith.constant 0 : index
    %c0_6 = arith.constant 0 : index
    %6 = vector.load %arg5[%c0_5, %c0_6] : memref<72x128xf32, #tpu.memory_space<vmem>>, vector<72x128xf32>
    tpu.vector_store %arg5[%c0_5, %c0_6], %5 {strides = array<i32>} : memref<72x128xf32, #tpu.memory_space<vmem>>, vector<72x128xf32>,
    return
  }
  func.func @transform_0(%arg0: i32, %arg1: i32) -> (i32, i32) {
    %c0_i32 = arith.constant 0 : i32
    %c0_i32_0 = arith.constant 0 : i32
    return %arg0, %c0_i32 : i32, i32
  }
  func.func @transform_1(%arg0: i32, %arg1: i32) -> (i32, i32) {
    %c0_i32 = arith.constant 0 : i32
    %c0_i32_0 = arith.constant 0 : i32
    return %c0_i32, %arg1 : i32, i32
  }
  func.func @transform_2(%arg0: i32, %arg1: i32) -> (i32, i32) {
    %c0_i32 = arith.constant 0 : i32
    %c0_i32_0 = arith.constant 0 : i32
    return %c0_i32, %arg1 : i32, i32
  }
  func.func @transform_3(%arg0: i32, %arg1: i32) -> (i32, i32) {
    %c0_i32 = arith.constant 0 : i32
    return %arg0, %arg1 : i32, i32
  }
}

module attributes {stable_mosaic.version = 11 : i64} {
  func.func @_lstm_recurrence_kernel(%arg0: i32, %arg1: memref<9x8x512xf32, #tpu.memory_space<vmem>>, %arg2: memref<128x512xbf16, #tpu.memory_space<vmem>>, %arg3: memref<9x8x128xbf16, #tpu.memory_space<vmem>>) attributes {dimension_semantics = [#tpu.dimension_semantics<arbitrary>], iteration_bounds = array<i64: 1>, scalar_prefetch = 0 : i64, scratch_operands = 0 : i64, tpu.core_type = #tpu.core_type<tc>, window_params = [{pipeline_mode = #tpu.pipeline_mode<synchronous>, transform_indices = @transform_0, window_bounds = array<i64: 9, 8, 512>}, {pipeline_mode = #tpu.pipeline_mode<synchronous>, transform_indices = @transform_1, window_bounds = array<i64: 128, 512>}, {pipeline_mode = #tpu.pipeline_mode<synchronous>, transform_indices = @transform_2, window_bounds = array<i64: 9, 8, 128>}]} {
    %cst = arith.constant 0.000000e+00 : f32
    %0 = vector.broadcast %cst : f32 to vector<8x128xf32>
    %cst_0 = arith.constant 0.000000e+00 : f32
    %1 = vector.broadcast %cst_0 : f32 to vector<8x128xf32>
    %c0_i32 = arith.constant 0 : i32
    %2 = arith.index_cast %c0_i32 : i32 to index
    %c0 = arith.constant 0 : index
    %c0_1 = arith.constant 0 : index
    %3 = vector.load %arg1[%2, %c0, %c0_1] : memref<9x8x512xf32, #tpu.memory_space<vmem>>, vector<1x8x512xf32>
    %4 = vector.shape_cast %3 : vector<1x8x512xf32> to vector<8x512xf32>
    %5 = arith.truncf %0 : vector<8x128xf32> to vector<8x128xbf16>
    %c0_2 = arith.constant 0 : index
    %c0_3 = arith.constant 0 : index
    %6 = vector.load %arg2[%c0_2, %c0_3] : memref<128x512xbf16, #tpu.memory_space<vmem>>, vector<128x512xbf16>
    %cst_4 = arith.constant dense<0.000000e+00> : vector<8x512xf32>
    %7 = tpu.matmul %5, %6, %cst_4 {dimension_numbers = #tpu.dot_dimension_numbers<[1], [0], [0], [1], [0, 0, 1, 1], [], []>} : vector<8x128xbf16>, vector<128x512xbf16>, vector<8x512xf32> -> vector<8x512xf32>
    %8 = arith.addf %4, %7 : vector<8x512xf32>
    %9 = vector.extract_strided_slice %8 {offsets = [0, 0], sizes = [8, 128], strides = [1, 1]} : vector<8x512xf32> to vector<8x128xf32>
    %10 = arith.negf %9 : vector<8x128xf32>
    %11 = math.exp %10 : vector<8x128xf32>
    %cst_5 = arith.constant 1.000000e+00 : f32
    %12 = vector.broadcast %cst_5 : f32 to vector<8x128xf32>
    %13 = arith.addf %12, %11 : vector<8x128xf32>
    %14 = arith.divf %12, %13 : vector<8x128xf32>
    %15 = vector.extract_strided_slice %8 {offsets = [0, 128], sizes = [8, 128], strides = [1, 1]} : vector<8x512xf32> to vector<8x128xf32>
    %16 = arith.negf %15 : vector<8x128xf32>
    %17 = math.exp %16 : vector<8x128xf32>
    %cst_6 = arith.constant 1.000000e+00 : f32
    %18 = vector.broadcast %cst_6 : f32 to vector<8x128xf32>
    %19 = arith.addf %18, %17 : vector<8x128xf32>
    %20 = arith.divf %18, %19 : vector<8x128xf32>
    %21 = vector.extract_strided_slice %8 {offsets = [0, 256], sizes = [8, 128], strides = [1, 1]} : vector<8x512xf32> to vector<8x128xf32>
    %22 = math.tanh %21 : vector<8x128xf32>
    %23 = vector.extract_strided_slice %8 {offsets = [0, 384], sizes = [8, 128], strides = [1, 1]} : vector<8x512xf32> to vector<8x128xf32>
    %24 = arith.negf %23 : vector<8x128xf32>
    %25 = math.exp %24 : vector<8x128xf32>
    %cst_7 = arith.constant 1.000000e+00 : f32
    %26 = vector.broadcast %cst_7 : f32 to vector<8x128xf32>
    %27 = arith.addf %26, %25 : vector<8x128xf32>
    %28 = arith.divf %26, %27 : vector<8x128xf32>
    %29 = arith.mulf %20, %1 : vector<8x128xf32>
    %30 = arith.mulf %14, %22 : vector<8x128xf32>
    %31 = arith.addf %29, %30 : vector<8x128xf32>
    %32 = math.tanh %31 : vector<8x128xf32>
    %33 = arith.mulf %28, %32 : vector<8x128xf32>
    %34 = arith.truncf %33 : vector<8x128xf32> to vector<8x128xbf16>
    %35 = arith.index_cast %c0_i32 : i32 to index
    %c0_8 = arith.constant 0 : index
    %c0_9 = arith.constant 0 : index
    %36 = vector.load %arg3[%35, %c0_8, %c0_9] : memref<9x8x128xbf16, #tpu.memory_space<vmem>>, vector<1x8x128xbf16>
    %37 = vector.shape_cast %36 : vector<1x8x128xbf16> to vector<8x128xbf16>
    %38 = vector.shape_cast %34 : vector<8x128xbf16> to vector<1x8x128xbf16>
    tpu.vector_store %arg3[%35, %c0_8, %c0_9], %38 {strides = array<i32>} : memref<9x8x128xbf16, #tpu.memory_space<vmem>>, vector<1x8x128xbf16>,
    %c1_i32 = arith.constant 1 : i32
    %39 = arith.index_cast %c1_i32 : i32 to index
    %c0_10 = arith.constant 0 : index
    %c0_11 = arith.constant 0 : index
    %40 = vector.load %arg1[%39, %c0_10, %c0_11] : memref<9x8x512xf32, #tpu.memory_space<vmem>>, vector<1x8x512xf32>
    %41 = vector.shape_cast %40 : vector<1x8x512xf32> to vector<8x512xf32>
    %42 = arith.truncf %33 : vector<8x128xf32> to vector<8x128xbf16>
    %c0_12 = arith.constant 0 : index
    %c0_13 = arith.constant 0 : index
    %43 = vector.load %arg2[%c0_12, %c0_13] : memref<128x512xbf16, #tpu.memory_space<vmem>>, vector<128x512xbf16>
    %cst_14 = arith.constant dense<0.000000e+00> : vector<8x512xf32>
    %44 = tpu.matmul %42, %43, %cst_14 {dimension_numbers = #tpu.dot_dimension_numbers<[1], [0], [0], [1], [0, 0, 1, 1], [], []>} : vector<8x128xbf16>, vector<128x512xbf16>, vector<8x512xf32> -> vector<8x512xf32>
    %45 = arith.addf %41, %44 : vector<8x512xf32>
    %46 = vector.extract_strided_slice %45 {offsets = [0, 0], sizes = [8, 128], strides = [1, 1]} : vector<8x512xf32> to vector<8x128xf32>
    %47 = arith.negf %46 : vector<8x128xf32>
    %48 = math.exp %47 : vector<8x128xf32>
    %cst_15 = arith.constant 1.000000e+00 : f32
    %49 = vector.broadcast %cst_15 : f32 to vector<8x128xf32>
    %50 = arith.addf %49, %48 : vector<8x128xf32>
    %51 = arith.divf %49, %50 : vector<8x128xf32>
    %52 = vector.extract_strided_slice %45 {offsets = [0, 128], sizes = [8, 128], strides = [1, 1]} : vector<8x512xf32> to vector<8x128xf32>
    %53 = arith.negf %52 : vector<8x128xf32>
    %54 = math.exp %53 : vector<8x128xf32>
    %cst_16 = arith.constant 1.000000e+00 : f32
    %55 = vector.broadcast %cst_16 : f32 to vector<8x128xf32>
    %56 = arith.addf %55, %54 : vector<8x128xf32>
    %57 = arith.divf %55, %56 : vector<8x128xf32>
    %58 = vector.extract_strided_slice %45 {offsets = [0, 256], sizes = [8, 128], strides = [1, 1]} : vector<8x512xf32> to vector<8x128xf32>
    %59 = math.tanh %58 : vector<8x128xf32>
    %60 = vector.extract_strided_slice %45 {offsets = [0, 384], sizes = [8, 128], strides = [1, 1]} : vector<8x512xf32> to vector<8x128xf32>
    %61 = arith.negf %60 : vector<8x128xf32>
    %62 = math.exp %61 : vector<8x128xf32>
    %cst_17 = arith.constant 1.000000e+00 : f32
    %63 = vector.broadcast %cst_17 : f32 to vector<8x128xf32>
    %64 = arith.addf %63, %62 : vector<8x128xf32>
    %65 = arith.divf %63, %64 : vector<8x128xf32>
    %66 = arith.mulf %57, %31 : vector<8x128xf32>
    %67 = arith.mulf %51, %59 : vector<8x128xf32>
    %68 = arith.addf %66, %67 : vector<8x128xf32>
    %69 = math.tanh %68 : vector<8x128xf32>
    %70 = arith.mulf %65, %69 : vector<8x128xf32>
    %71 = arith.truncf %70 : vector<8x128xf32> to vector<8x128xbf16>
    %72 = arith.index_cast %c1_i32 : i32 to index
    %c0_18 = arith.constant 0 : index
    %c0_19 = arith.constant 0 : index
    %73 = vector.load %arg3[%72, %c0_18, %c0_19] : memref<9x8x128xbf16, #tpu.memory_space<vmem>>, vector<1x8x128xbf16>
    %74 = vector.shape_cast %73 : vector<1x8x128xbf16> to vector<8x128xbf16>
    %75 = vector.shape_cast %71 : vector<8x128xbf16> to vector<1x8x128xbf16>
    tpu.vector_store %arg3[%72, %c0_18, %c0_19], %75 {strides = array<i32>} : memref<9x8x128xbf16, #tpu.memory_space<vmem>>, vector<1x8x128xbf16>,
    %c2_i32 = arith.constant 2 : i32
    %76 = arith.index_cast %c2_i32 : i32 to index
    %c0_20 = arith.constant 0 : index
    %c0_21 = arith.constant 0 : index
    %77 = vector.load %arg1[%76, %c0_20, %c0_21] : memref<9x8x512xf32, #tpu.memory_space<vmem>>, vector<1x8x512xf32>
    %78 = vector.shape_cast %77 : vector<1x8x512xf32> to vector<8x512xf32>
    %79 = arith.truncf %70 : vector<8x128xf32> to vector<8x128xbf16>
    %c0_22 = arith.constant 0 : index
    %c0_23 = arith.constant 0 : index
    %80 = vector.load %arg2[%c0_22, %c0_23] : memref<128x512xbf16, #tpu.memory_space<vmem>>, vector<128x512xbf16>
    %cst_24 = arith.constant dense<0.000000e+00> : vector<8x512xf32>
    %81 = tpu.matmul %79, %80, %cst_24 {dimension_numbers = #tpu.dot_dimension_numbers<[1], [0], [0], [1], [0, 0, 1, 1], [], []>} : vector<8x128xbf16>, vector<128x512xbf16>, vector<8x512xf32> -> vector<8x512xf32>
    %82 = arith.addf %78, %81 : vector<8x512xf32>
    %83 = vector.extract_strided_slice %82 {offsets = [0, 0], sizes = [8, 128], strides = [1, 1]} : vector<8x512xf32> to vector<8x128xf32>
    %84 = arith.negf %83 : vector<8x128xf32>
    %85 = math.exp %84 : vector<8x128xf32>
    %cst_25 = arith.constant 1.000000e+00 : f32
    %86 = vector.broadcast %cst_25 : f32 to vector<8x128xf32>
    %87 = arith.addf %86, %85 : vector<8x128xf32>
    %88 = arith.divf %86, %87 : vector<8x128xf32>
    %89 = vector.extract_strided_slice %82 {offsets = [0, 128], sizes = [8, 128], strides = [1, 1]} : vector<8x512xf32> to vector<8x128xf32>
    %90 = arith.negf %89 : vector<8x128xf32>
    %91 = math.exp %90 : vector<8x128xf32>
    %cst_26 = arith.constant 1.000000e+00 : f32
    %92 = vector.broadcast %cst_26 : f32 to vector<8x128xf32>
    %93 = arith.addf %92, %91 : vector<8x128xf32>
    %94 = arith.divf %92, %93 : vector<8x128xf32>
    %95 = vector.extract_strided_slice %82 {offsets = [0, 256], sizes = [8, 128], strides = [1, 1]} : vector<8x512xf32> to vector<8x128xf32>
    %96 = math.tanh %95 : vector<8x128xf32>
    %97 = vector.extract_strided_slice %82 {offsets = [0, 384], sizes = [8, 128], strides = [1, 1]} : vector<8x512xf32> to vector<8x128xf32>
    %98 = arith.negf %97 : vector<8x128xf32>
    %99 = math.exp %98 : vector<8x128xf32>
    %cst_27 = arith.constant 1.000000e+00 : f32
    %100 = vector.broadcast %cst_27 : f32 to vector<8x128xf32>
    %101 = arith.addf %100, %99 : vector<8x128xf32>
    %102 = arith.divf %100, %101 : vector<8x128xf32>
    %103 = arith.mulf %94, %68 : vector<8x128xf32>
    %104 = arith.mulf %88, %96 : vector<8x128xf32>
    %105 = arith.addf %103, %104 : vector<8x128xf32>
    %106 = math.tanh %105 : vector<8x128xf32>
    %107 = arith.mulf %102, %106 : vector<8x128xf32>
    %108 = arith.truncf %107 : vector<8x128xf32> to vector<8x128xbf16>
    %109 = arith.index_cast %c2_i32 : i32 to index
    %c0_28 = arith.constant 0 : index
    %c0_29 = arith.constant 0 : index
    %110 = vector.load %arg3[%109, %c0_28, %c0_29] : memref<9x8x128xbf16, #tpu.memory_space<vmem>>, vector<1x8x128xbf16>
    %111 = vector.shape_cast %110 : vector<1x8x128xbf16> to vector<8x128xbf16>
    %112 = vector.shape_cast %108 : vector<8x128xbf16> to vector<1x8x128xbf16>
    tpu.vector_store %arg3[%109, %c0_28, %c0_29], %112 {strides = array<i32>} : memref<9x8x128xbf16, #tpu.memory_space<vmem>>, vector<1x8x128xbf16>,
    %c3_i32 = arith.constant 3 : i32
    %113 = arith.index_cast %c3_i32 : i32 to index
    %c0_30 = arith.constant 0 : index
    %c0_31 = arith.constant 0 : index
    %114 = vector.load %arg1[%113, %c0_30, %c0_31] : memref<9x8x512xf32, #tpu.memory_space<vmem>>, vector<1x8x512xf32>
    %115 = vector.shape_cast %114 : vector<1x8x512xf32> to vector<8x512xf32>
    %116 = arith.truncf %107 : vector<8x128xf32> to vector<8x128xbf16>
    %c0_32 = arith.constant 0 : index
    %c0_33 = arith.constant 0 : index
    %117 = vector.load %arg2[%c0_32, %c0_33] : memref<128x512xbf16, #tpu.memory_space<vmem>>, vector<128x512xbf16>
    %cst_34 = arith.constant dense<0.000000e+00> : vector<8x512xf32>
    %118 = tpu.matmul %116, %117, %cst_34 {dimension_numbers = #tpu.dot_dimension_numbers<[1], [0], [0], [1], [0, 0, 1, 1], [], []>} : vector<8x128xbf16>, vector<128x512xbf16>, vector<8x512xf32> -> vector<8x512xf32>
    %119 = arith.addf %115, %118 : vector<8x512xf32>
    %120 = vector.extract_strided_slice %119 {offsets = [0, 0], sizes = [8, 128], strides = [1, 1]} : vector<8x512xf32> to vector<8x128xf32>
    %121 = arith.negf %120 : vector<8x128xf32>
    %122 = math.exp %121 : vector<8x128xf32>
    %cst_35 = arith.constant 1.000000e+00 : f32
    %123 = vector.broadcast %cst_35 : f32 to vector<8x128xf32>
    %124 = arith.addf %123, %122 : vector<8x128xf32>
    %125 = arith.divf %123, %124 : vector<8x128xf32>
    %126 = vector.extract_strided_slice %119 {offsets = [0, 128], sizes = [8, 128], strides = [1, 1]} : vector<8x512xf32> to vector<8x128xf32>
    %127 = arith.negf %126 : vector<8x128xf32>
    %128 = math.exp %127 : vector<8x128xf32>
    %cst_36 = arith.constant 1.000000e+00 : f32
    %129 = vector.broadcast %cst_36 : f32 to vector<8x128xf32>
    %130 = arith.addf %129, %128 : vector<8x128xf32>
    %131 = arith.divf %129, %130 : vector<8x128xf32>
    %132 = vector.extract_strided_slice %119 {offsets = [0, 256], sizes = [8, 128], strides = [1, 1]} : vector<8x512xf32> to vector<8x128xf32>
    %133 = math.tanh %132 : vector<8x128xf32>
    %134 = vector.extract_strided_slice %119 {offsets = [0, 384], sizes = [8, 128], strides = [1, 1]} : vector<8x512xf32> to vector<8x128xf32>
    %135 = arith.negf %134 : vector<8x128xf32>
    %136 = math.exp %135 : vector<8x128xf32>
    %cst_37 = arith.constant 1.000000e+00 : f32
    %137 = vector.broadcast %cst_37 : f32 to vector<8x128xf32>
    %138 = arith.addf %137, %136 : vector<8x128xf32>
    %139 = arith.divf %137, %138 : vector<8x128xf32>
    %140 = arith.mulf %131, %105 : vector<8x128xf32>
    %141 = arith.mulf %125, %133 : vector<8x128xf32>
    %142 = arith.addf %140, %141 : vector<8x128xf32>
    %143 = math.tanh %142 : vector<8x128xf32>
    %144 = arith.mulf %139, %143 : vector<8x128xf32>
    %145 = arith.truncf %144 : vector<8x128xf32> to vector<8x128xbf16>
    %146 = arith.index_cast %c3_i32 : i32 to index
    %c0_38 = arith.constant 0 : index
    %c0_39 = arith.constant 0 : index
    %147 = vector.load %arg3[%146, %c0_38, %c0_39] : memref<9x8x128xbf16, #tpu.memory_space<vmem>>, vector<1x8x128xbf16>
    %148 = vector.shape_cast %147 : vector<1x8x128xbf16> to vector<8x128xbf16>
    %149 = vector.shape_cast %145 : vector<8x128xbf16> to vector<1x8x128xbf16>
    tpu.vector_store %arg3[%146, %c0_38, %c0_39], %149 {strides = array<i32>} : memref<9x8x128xbf16, #tpu.memory_space<vmem>>, vector<1x8x128xbf16>,
    %c4_i32 = arith.constant 4 : i32
    %150 = arith.index_cast %c4_i32 : i32 to index
    %c0_40 = arith.constant 0 : index
    %c0_41 = arith.constant 0 : index
    %151 = vector.load %arg1[%150, %c0_40, %c0_41] : memref<9x8x512xf32, #tpu.memory_space<vmem>>, vector<1x8x512xf32>
    %152 = vector.shape_cast %151 : vector<1x8x512xf32> to vector<8x512xf32>
    %153 = arith.truncf %144 : vector<8x128xf32> to vector<8x128xbf16>
    %c0_42 = arith.constant 0 : index
    %c0_43 = arith.constant 0 : index
    %154 = vector.load %arg2[%c0_42, %c0_43] : memref<128x512xbf16, #tpu.memory_space<vmem>>, vector<128x512xbf16>
    %cst_44 = arith.constant dense<0.000000e+00> : vector<8x512xf32>
    %155 = tpu.matmul %153, %154, %cst_44 {dimension_numbers = #tpu.dot_dimension_numbers<[1], [0], [0], [1], [0, 0, 1, 1], [], []>} : vector<8x128xbf16>, vector<128x512xbf16>, vector<8x512xf32> -> vector<8x512xf32>
    %156 = arith.addf %152, %155 : vector<8x512xf32>
    %157 = vector.extract_strided_slice %156 {offsets = [0, 0], sizes = [8, 128], strides = [1, 1]} : vector<8x512xf32> to vector<8x128xf32>
    %158 = arith.negf %157 : vector<8x128xf32>
    %159 = math.exp %158 : vector<8x128xf32>
    %cst_45 = arith.constant 1.000000e+00 : f32
    %160 = vector.broadcast %cst_45 : f32 to vector<8x128xf32>
    %161 = arith.addf %160, %159 : vector<8x128xf32>
    %162 = arith.divf %160, %161 : vector<8x128xf32>
    %163 = vector.extract_strided_slice %156 {offsets = [0, 128], sizes = [8, 128], strides = [1, 1]} : vector<8x512xf32> to vector<8x128xf32>
    %164 = arith.negf %163 : vector<8x128xf32>
    %165 = math.exp %164 : vector<8x128xf32>
    %cst_46 = arith.constant 1.000000e+00 : f32
    %166 = vector.broadcast %cst_46 : f32 to vector<8x128xf32>
    %167 = arith.addf %166, %165 : vector<8x128xf32>
    %168 = arith.divf %166, %167 : vector<8x128xf32>
    %169 = vector.extract_strided_slice %156 {offsets = [0, 256], sizes = [8, 128], strides = [1, 1]} : vector<8x512xf32> to vector<8x128xf32>
    %170 = math.tanh %169 : vector<8x128xf32>
    %171 = vector.extract_strided_slice %156 {offsets = [0, 384], sizes = [8, 128], strides = [1, 1]} : vector<8x512xf32> to vector<8x128xf32>
    %172 = arith.negf %171 : vector<8x128xf32>
    %173 = math.exp %172 : vector<8x128xf32>
    %cst_47 = arith.constant 1.000000e+00 : f32
    %174 = vector.broadcast %cst_47 : f32 to vector<8x128xf32>
    %175 = arith.addf %174, %173 : vector<8x128xf32>
    %176 = arith.divf %174, %175 : vector<8x128xf32>
    %177 = arith.mulf %168, %142 : vector<8x128xf32>
    %178 = arith.mulf %162, %170 : vector<8x128xf32>
    %179 = arith.addf %177, %178 : vector<8x128xf32>
    %180 = math.tanh %179 : vector<8x128xf32>
    %181 = arith.mulf %176, %180 : vector<8x128xf32>
    %182 = arith.truncf %181 : vector<8x128xf32> to vector<8x128xbf16>
    %183 = arith.index_cast %c4_i32 : i32 to index
    %c0_48 = arith.constant 0 : index
    %c0_49 = arith.constant 0 : index
    %184 = vector.load %arg3[%183, %c0_48, %c0_49] : memref<9x8x128xbf16, #tpu.memory_space<vmem>>, vector<1x8x128xbf16>
    %185 = vector.shape_cast %184 : vector<1x8x128xbf16> to vector<8x128xbf16>
    %186 = vector.shape_cast %182 : vector<8x128xbf16> to vector<1x8x128xbf16>
    tpu.vector_store %arg3[%183, %c0_48, %c0_49], %186 {strides = array<i32>} : memref<9x8x128xbf16, #tpu.memory_space<vmem>>, vector<1x8x128xbf16>,
    %c5_i32 = arith.constant 5 : i32
    %187 = arith.index_cast %c5_i32 : i32 to index
    %c0_50 = arith.constant 0 : index
    %c0_51 = arith.constant 0 : index
    %188 = vector.load %arg1[%187, %c0_50, %c0_51] : memref<9x8x512xf32, #tpu.memory_space<vmem>>, vector<1x8x512xf32>
    %189 = vector.shape_cast %188 : vector<1x8x512xf32> to vector<8x512xf32>
    %190 = arith.truncf %181 : vector<8x128xf32> to vector<8x128xbf16>
    %c0_52 = arith.constant 0 : index
    %c0_53 = arith.constant 0 : index
    %191 = vector.load %arg2[%c0_52, %c0_53] : memref<128x512xbf16, #tpu.memory_space<vmem>>, vector<128x512xbf16>
    %cst_54 = arith.constant dense<0.000000e+00> : vector<8x512xf32>
    %192 = tpu.matmul %190, %191, %cst_54 {dimension_numbers = #tpu.dot_dimension_numbers<[1], [0], [0], [1], [0, 0, 1, 1], [], []>} : vector<8x128xbf16>, vector<128x512xbf16>, vector<8x512xf32> -> vector<8x512xf32>
    %193 = arith.addf %189, %192 : vector<8x512xf32>
    %194 = vector.extract_strided_slice %193 {offsets = [0, 0], sizes = [8, 128], strides = [1, 1]} : vector<8x512xf32> to vector<8x128xf32>
    %195 = arith.negf %194 : vector<8x128xf32>
    %196 = math.exp %195 : vector<8x128xf32>
    %cst_55 = arith.constant 1.000000e+00 : f32
    %197 = vector.broadcast %cst_55 : f32 to vector<8x128xf32>
    %198 = arith.addf %197, %196 : vector<8x128xf32>
    %199 = arith.divf %197, %198 : vector<8x128xf32>
    %200 = vector.extract_strided_slice %193 {offsets = [0, 128], sizes = [8, 128], strides = [1, 1]} : vector<8x512xf32> to vector<8x128xf32>
    %201 = arith.negf %200 : vector<8x128xf32>
    %202 = math.exp %201 : vector<8x128xf32>
    %cst_56 = arith.constant 1.000000e+00 : f32
    %203 = vector.broadcast %cst_56 : f32 to vector<8x128xf32>
    %204 = arith.addf %203, %202 : vector<8x128xf32>
    %205 = arith.divf %203, %204 : vector<8x128xf32>
    %206 = vector.extract_strided_slice %193 {offsets = [0, 256], sizes = [8, 128], strides = [1, 1]} : vector<8x512xf32> to vector<8x128xf32>
    %207 = math.tanh %206 : vector<8x128xf32>
    %208 = vector.extract_strided_slice %193 {offsets = [0, 384], sizes = [8, 128], strides = [1, 1]} : vector<8x512xf32> to vector<8x128xf32>
    %209 = arith.negf %208 : vector<8x128xf32>
    %210 = math.exp %209 : vector<8x128xf32>
    %cst_57 = arith.constant 1.000000e+00 : f32
    %211 = vector.broadcast %cst_57 : f32 to vector<8x128xf32>
    %212 = arith.addf %211, %210 : vector<8x128xf32>
    %213 = arith.divf %211, %212 : vector<8x128xf32>
    %214 = arith.mulf %205, %179 : vector<8x128xf32>
    %215 = arith.mulf %199, %207 : vector<8x128xf32>
    %216 = arith.addf %214, %215 : vector<8x128xf32>
    %217 = math.tanh %216 : vector<8x128xf32>
    %218 = arith.mulf %213, %217 : vector<8x128xf32>
    %219 = arith.truncf %218 : vector<8x128xf32> to vector<8x128xbf16>
    %220 = arith.index_cast %c5_i32 : i32 to index
    %c0_58 = arith.constant 0 : index
    %c0_59 = arith.constant 0 : index
    %221 = vector.load %arg3[%220, %c0_58, %c0_59] : memref<9x8x128xbf16, #tpu.memory_space<vmem>>, vector<1x8x128xbf16>
    %222 = vector.shape_cast %221 : vector<1x8x128xbf16> to vector<8x128xbf16>
    %223 = vector.shape_cast %219 : vector<8x128xbf16> to vector<1x8x128xbf16>
    tpu.vector_store %arg3[%220, %c0_58, %c0_59], %223 {strides = array<i32>} : memref<9x8x128xbf16, #tpu.memory_space<vmem>>, vector<1x8x128xbf16>,
    %c6_i32 = arith.constant 6 : i32
    %224 = arith.index_cast %c6_i32 : i32 to index
    %c0_60 = arith.constant 0 : index
    %c0_61 = arith.constant 0 : index
    %225 = vector.load %arg1[%224, %c0_60, %c0_61] : memref<9x8x512xf32, #tpu.memory_space<vmem>>, vector<1x8x512xf32>
    %226 = vector.shape_cast %225 : vector<1x8x512xf32> to vector<8x512xf32>
    %227 = arith.truncf %218 : vector<8x128xf32> to vector<8x128xbf16>
    %c0_62 = arith.constant 0 : index
    %c0_63 = arith.constant 0 : index
    %228 = vector.load %arg2[%c0_62, %c0_63] : memref<128x512xbf16, #tpu.memory_space<vmem>>, vector<128x512xbf16>
    %cst_64 = arith.constant dense<0.000000e+00> : vector<8x512xf32>
    %229 = tpu.matmul %227, %228, %cst_64 {dimension_numbers = #tpu.dot_dimension_numbers<[1], [0], [0], [1], [0, 0, 1, 1], [], []>} : vector<8x128xbf16>, vector<128x512xbf16>, vector<8x512xf32> -> vector<8x512xf32>
    %230 = arith.addf %226, %229 : vector<8x512xf32>
    %231 = vector.extract_strided_slice %230 {offsets = [0, 0], sizes = [8, 128], strides = [1, 1]} : vector<8x512xf32> to vector<8x128xf32>
    %232 = arith.negf %231 : vector<8x128xf32>
    %233 = math.exp %232 : vector<8x128xf32>
    %cst_65 = arith.constant 1.000000e+00 : f32
    %234 = vector.broadcast %cst_65 : f32 to vector<8x128xf32>
    %235 = arith.addf %234, %233 : vector<8x128xf32>
    %236 = arith.divf %234, %235 : vector<8x128xf32>
    %237 = vector.extract_strided_slice %230 {offsets = [0, 128], sizes = [8, 128], strides = [1, 1]} : vector<8x512xf32> to vector<8x128xf32>
    %238 = arith.negf %237 : vector<8x128xf32>
    %239 = math.exp %238 : vector<8x128xf32>
    %cst_66 = arith.constant 1.000000e+00 : f32
    %240 = vector.broadcast %cst_66 : f32 to vector<8x128xf32>
    %241 = arith.addf %240, %239 : vector<8x128xf32>
    %242 = arith.divf %240, %241 : vector<8x128xf32>
    %243 = vector.extract_strided_slice %230 {offsets = [0, 256], sizes = [8, 128], strides = [1, 1]} : vector<8x512xf32> to vector<8x128xf32>
    %244 = math.tanh %243 : vector<8x128xf32>
    %245 = vector.extract_strided_slice %230 {offsets = [0, 384], sizes = [8, 128], strides = [1, 1]} : vector<8x512xf32> to vector<8x128xf32>
    %246 = arith.negf %245 : vector<8x128xf32>
    %247 = math.exp %246 : vector<8x128xf32>
    %cst_67 = arith.constant 1.000000e+00 : f32
    %248 = vector.broadcast %cst_67 : f32 to vector<8x128xf32>
    %249 = arith.addf %248, %247 : vector<8x128xf32>
    %250 = arith.divf %248, %249 : vector<8x128xf32>
    %251 = arith.mulf %242, %216 : vector<8x128xf32>
    %252 = arith.mulf %236, %244 : vector<8x128xf32>
    %253 = arith.addf %251, %252 : vector<8x128xf32>
    %254 = math.tanh %253 : vector<8x128xf32>
    %255 = arith.mulf %250, %254 : vector<8x128xf32>
    %256 = arith.truncf %255 : vector<8x128xf32> to vector<8x128xbf16>
    %257 = arith.index_cast %c6_i32 : i32 to index
    %c0_68 = arith.constant 0 : index
    %c0_69 = arith.constant 0 : index
    %258 = vector.load %arg3[%257, %c0_68, %c0_69] : memref<9x8x128xbf16, #tpu.memory_space<vmem>>, vector<1x8x128xbf16>
    %259 = vector.shape_cast %258 : vector<1x8x128xbf16> to vector<8x128xbf16>
    %260 = vector.shape_cast %256 : vector<8x128xbf16> to vector<1x8x128xbf16>
    tpu.vector_store %arg3[%257, %c0_68, %c0_69], %260 {strides = array<i32>} : memref<9x8x128xbf16, #tpu.memory_space<vmem>>, vector<1x8x128xbf16>,
    %c7_i32 = arith.constant 7 : i32
    %261 = arith.index_cast %c7_i32 : i32 to index
    %c0_70 = arith.constant 0 : index
    %c0_71 = arith.constant 0 : index
    %262 = vector.load %arg1[%261, %c0_70, %c0_71] : memref<9x8x512xf32, #tpu.memory_space<vmem>>, vector<1x8x512xf32>
    %263 = vector.shape_cast %262 : vector<1x8x512xf32> to vector<8x512xf32>
    %264 = arith.truncf %255 : vector<8x128xf32> to vector<8x128xbf16>
    %c0_72 = arith.constant 0 : index
    %c0_73 = arith.constant 0 : index
    %265 = vector.load %arg2[%c0_72, %c0_73] : memref<128x512xbf16, #tpu.memory_space<vmem>>, vector<128x512xbf16>
    %cst_74 = arith.constant dense<0.000000e+00> : vector<8x512xf32>
    %266 = tpu.matmul %264, %265, %cst_74 {dimension_numbers = #tpu.dot_dimension_numbers<[1], [0], [0], [1], [0, 0, 1, 1], [], []>} : vector<8x128xbf16>, vector<128x512xbf16>, vector<8x512xf32> -> vector<8x512xf32>
    %267 = arith.addf %263, %266 : vector<8x512xf32>
    %268 = vector.extract_strided_slice %267 {offsets = [0, 0], sizes = [8, 128], strides = [1, 1]} : vector<8x512xf32> to vector<8x128xf32>
    %269 = arith.negf %268 : vector<8x128xf32>
    %270 = math.exp %269 : vector<8x128xf32>
    %cst_75 = arith.constant 1.000000e+00 : f32
    %271 = vector.broadcast %cst_75 : f32 to vector<8x128xf32>
    %272 = arith.addf %271, %270 : vector<8x128xf32>
    %273 = arith.divf %271, %272 : vector<8x128xf32>
    %274 = vector.extract_strided_slice %267 {offsets = [0, 128], sizes = [8, 128], strides = [1, 1]} : vector<8x512xf32> to vector<8x128xf32>
    %275 = arith.negf %274 : vector<8x128xf32>
    %276 = math.exp %275 : vector<8x128xf32>
    %cst_76 = arith.constant 1.000000e+00 : f32
    %277 = vector.broadcast %cst_76 : f32 to vector<8x128xf32>
    %278 = arith.addf %277, %276 : vector<8x128xf32>
    %279 = arith.divf %277, %278 : vector<8x128xf32>
    %280 = vector.extract_strided_slice %267 {offsets = [0, 256], sizes = [8, 128], strides = [1, 1]} : vector<8x512xf32> to vector<8x128xf32>
    %281 = math.tanh %280 : vector<8x128xf32>
    %282 = vector.extract_strided_slice %267 {offsets = [0, 384], sizes = [8, 128], strides = [1, 1]} : vector<8x512xf32> to vector<8x128xf32>
    %283 = arith.negf %282 : vector<8x128xf32>
    %284 = math.exp %283 : vector<8x128xf32>
    %cst_77 = arith.constant 1.000000e+00 : f32
    %285 = vector.broadcast %cst_77 : f32 to vector<8x128xf32>
    %286 = arith.addf %285, %284 : vector<8x128xf32>
    %287 = arith.divf %285, %286 : vector<8x128xf32>
    %288 = arith.mulf %279, %253 : vector<8x128xf32>
    %289 = arith.mulf %273, %281 : vector<8x128xf32>
    %290 = arith.addf %288, %289 : vector<8x128xf32>
    %291 = math.tanh %290 : vector<8x128xf32>
    %292 = arith.mulf %287, %291 : vector<8x128xf32>
    %293 = arith.truncf %292 : vector<8x128xf32> to vector<8x128xbf16>
    %294 = arith.index_cast %c7_i32 : i32 to index
    %c0_78 = arith.constant 0 : index
    %c0_79 = arith.constant 0 : index
    %295 = vector.load %arg3[%294, %c0_78, %c0_79] : memref<9x8x128xbf16, #tpu.memory_space<vmem>>, vector<1x8x128xbf16>
    %296 = vector.shape_cast %295 : vector<1x8x128xbf16> to vector<8x128xbf16>
    %297 = vector.shape_cast %293 : vector<8x128xbf16> to vector<1x8x128xbf16>
    tpu.vector_store %arg3[%294, %c0_78, %c0_79], %297 {strides = array<i32>} : memref<9x8x128xbf16, #tpu.memory_space<vmem>>, vector<1x8x128xbf16>,
    %c8_i32 = arith.constant 8 : i32
    %298 = arith.index_cast %c8_i32 : i32 to index
    %c0_80 = arith.constant 0 : index
    %c0_81 = arith.constant 0 : index
    %299 = vector.load %arg1[%298, %c0_80, %c0_81] : memref<9x8x512xf32, #tpu.memory_space<vmem>>, vector<1x8x512xf32>
    %300 = vector.shape_cast %299 : vector<1x8x512xf32> to vector<8x512xf32>
    %301 = arith.truncf %292 : vector<8x128xf32> to vector<8x128xbf16>
    %c0_82 = arith.constant 0 : index
    %c0_83 = arith.constant 0 : index
    %302 = vector.load %arg2[%c0_82, %c0_83] : memref<128x512xbf16, #tpu.memory_space<vmem>>, vector<128x512xbf16>
    %cst_84 = arith.constant dense<0.000000e+00> : vector<8x512xf32>
    %303 = tpu.matmul %301, %302, %cst_84 {dimension_numbers = #tpu.dot_dimension_numbers<[1], [0], [0], [1], [0, 0, 1, 1], [], []>} : vector<8x128xbf16>, vector<128x512xbf16>, vector<8x512xf32> -> vector<8x512xf32>
    %304 = arith.addf %300, %303 : vector<8x512xf32>
    %305 = vector.extract_strided_slice %304 {offsets = [0, 0], sizes = [8, 128], strides = [1, 1]} : vector<8x512xf32> to vector<8x128xf32>
    %306 = arith.negf %305 : vector<8x128xf32>
    %307 = math.exp %306 : vector<8x128xf32>
    %cst_85 = arith.constant 1.000000e+00 : f32
    %308 = vector.broadcast %cst_85 : f32 to vector<8x128xf32>
    %309 = arith.addf %308, %307 : vector<8x128xf32>
    %310 = arith.divf %308, %309 : vector<8x128xf32>
    %311 = vector.extract_strided_slice %304 {offsets = [0, 128], sizes = [8, 128], strides = [1, 1]} : vector<8x512xf32> to vector<8x128xf32>
    %312 = arith.negf %311 : vector<8x128xf32>
    %313 = math.exp %312 : vector<8x128xf32>
    %cst_86 = arith.constant 1.000000e+00 : f32
    %314 = vector.broadcast %cst_86 : f32 to vector<8x128xf32>
    %315 = arith.addf %314, %313 : vector<8x128xf32>
    %316 = arith.divf %314, %315 : vector<8x128xf32>
    %317 = vector.extract_strided_slice %304 {offsets = [0, 256], sizes = [8, 128], strides = [1, 1]} : vector<8x512xf32> to vector<8x128xf32>
    %318 = math.tanh %317 : vector<8x128xf32>
    %319 = vector.extract_strided_slice %304 {offsets = [0, 384], sizes = [8, 128], strides = [1, 1]} : vector<8x512xf32> to vector<8x128xf32>
    %320 = arith.negf %319 : vector<8x128xf32>
    %321 = math.exp %320 : vector<8x128xf32>
    %cst_87 = arith.constant 1.000000e+00 : f32
    %322 = vector.broadcast %cst_87 : f32 to vector<8x128xf32>
    %323 = arith.addf %322, %321 : vector<8x128xf32>
    %324 = arith.divf %322, %323 : vector<8x128xf32>
    %325 = arith.mulf %316, %290 : vector<8x128xf32>
    %326 = arith.mulf %310, %318 : vector<8x128xf32>
    %327 = arith.addf %325, %326 : vector<8x128xf32>
    %328 = math.tanh %327 : vector<8x128xf32>
    %329 = arith.mulf %324, %328 : vector<8x128xf32>
    %330 = arith.truncf %329 : vector<8x128xf32> to vector<8x128xbf16>
    %331 = arith.index_cast %c8_i32 : i32 to index
    %c0_88 = arith.constant 0 : index
    %c0_89 = arith.constant 0 : index
    %332 = vector.load %arg3[%331, %c0_88, %c0_89] : memref<9x8x128xbf16, #tpu.memory_space<vmem>>, vector<1x8x128xbf16>
    %333 = vector.shape_cast %332 : vector<1x8x128xbf16> to vector<8x128xbf16>
    %334 = vector.shape_cast %330 : vector<8x128xbf16> to vector<1x8x128xbf16>
    tpu.vector_store %arg3[%331, %c0_88, %c0_89], %334 {strides = array<i32>} : memref<9x8x128xbf16, #tpu.memory_space<vmem>>, vector<1x8x128xbf16>,
    %c9_i32 = arith.constant 9 : i32
    return
  }
  func.func @transform_0(%arg0: i32) -> (i32, i32, i32) {
    %c0_i32 = arith.constant 0 : i32
    %c0_i32_0 = arith.constant 0 : i32
    %c0_i32_1 = arith.constant 0 : i32
    %c0_i32_2 = arith.constant 0 : i32
    return %c0_i32, %c0_i32_0, %c0_i32_1 : i32, i32, i32
  }
  func.func @transform_1(%arg0: i32) -> (i32, i32) {
    %c0_i32 = arith.constant 0 : i32
    %c0_i32_0 = arith.constant 0 : i32
    %c0_i32_1 = arith.constant 0 : i32
    return %c0_i32, %c0_i32_0 : i32, i32
  }
  func.func @transform_2(%arg0: i32) -> (i32, i32, i32) {
    %c0_i32 = arith.constant 0 : i32
    %c0_i32_0 = arith.constant 0 : i32
    %c0_i32_1 = arith.constant 0 : i32
    %c0_i32_2 = arith.constant 0 : i32
    return %c0_i32, %c0_i32_0, %c0_i32_1 : i32, i32, i32
  }
}

</mosaic_0001>

<bundles_post_ra>
// kernel: _lambda_.5
= control target key start
LH: loop header
LB: loop body
LE: loop exit
PB: predicated region body
PF: predicated region fallthrough
CT: control target
= control target key end

     0   :  { %v302_v0 = vmov 0.0   ;;  %vm303_vm0 = vmmov 0   ;;  %s398_s1 = inlined_call_operand.vmem [shape: bf16[128,128], index: 1, kind: input, shape index: {}]   ;;  %s399_s0 = inlined_call_operand.vmem [shape: bf16[72,128], index: 0, kind: input, shape index: {}]   ;;  %s400_s2 = inlined_call_operand.vmem [shape: f32[1,128], index: 2, kind: input, shape index: {}]   ;;  %s401_s3 = inlined_call_operand.vmem [shape: f32[72,128], index: 3, kind: output, shape index: {}]  }
   0x1   :  { %235 = vmatprep.subr.bf16.mxu0 %v302_v0  ;;  %v289_v1 = vld [vmem:[%s398_s1 + $0x38] sm:$0xff]   ;;  %271 = vmatprep.subr.bf16.mxu1 %v302_v0  ;;  %v290_v2 = vld [vmem:[%s398_s1 + $0x30] sm:$0xff]   ;;  %v291_v3 = vld [vmem:[%s398_s1 + $0x28] sm:$0xff]  }
   0x2   :  { %251 = vmatprep.mubr.msk.bf16.mxu0 %vm303_vm0, %v302_v0  ;;  %263 = vmatprep.mubr.msk.bf16.mxu1 %vm303_vm0, %v302_v0  ;;  %v292_v4 = vld [vmem:[%s398_s1 + $0x20] sm:$0xff]   ;;  %v293_v5 = vld [vmem:[%s398_s1 + $0x18] sm:$0xff]   ;;  %v294_v6 = vld [vmem:[%s398_s1 + $0x10] sm:$0xff]  }
   0x3   :  { %236 = vmatpush3.bf16.msra.mxu0 %v289_v1  ;;  %279 = vmatpush3.bf16.msra.mxu1 %v289_v1  ;;  %v295_v7 = vld [vmem:[%s398_s1 + $0x8] sm:$0xff]   ;;  %v296_v8 = vld [vmem:[%s398_s1] sm:$0xff]   ;;  %v298_v10 = vld [vmem:[%s399_s0 + $0x18] sm:$0xff]  }
   0x4   :  { %237 = vmatprep.subr.bf16.mxu0 %v302_v0  ;;  %272 = vmatprep.subr.bf16.mxu1 %v302_v0  ;;  %v297_v9 = vld [vmem:[%s399_s0] sm:$0xff]   ;;  %v299_v11 = vld [vmem:[%s399_s0 + $0x8] sm:$0xff]   ;;  %v301_v13 = vld [vmem:[%s399_s0 + $0x10] sm:$0xff]  }
   0x5   :  { %v300_v12 = vld [vmem:[%s399_s0 + $0x20] ss:$0 sps:$4 sm:$0xff]  }
   0x6   :  { %v208_v14 = vld [vmem:[%s400_s2] ss:$0 sm:$0xff] }
   0x7   :  { %238 = vmatpush3.bf16.msra.mxu0 %v290_v2  ;;  %280 = vmatpush3.bf16.msra.mxu1 %v290_v2 }
   0x8   :  { %239 = vmatprep.subr.bf16.mxu0 %v302_v0  ;;  %273 = vmatprep.subr.bf16.mxu1 %v302_v0 }
   0xb   :  { %240 = vmatpush3.bf16.msra.mxu0 %v291_v3  ;;  %281 = vmatpush3.bf16.msra.mxu1 %v291_v3 }
   0xc   :  { %241 = vmatprep.subr.bf16.mxu0 %v302_v0  ;;  %274 = vmatprep.subr.bf16.mxu1 %v302_v0 }
   0xf   :  { %242 = vmatpush3.bf16.msra.mxu0 %v292_v4  ;;  %282 = vmatpush3.bf16.msra.mxu1 %v292_v4 }
  0x10   :  { %243 = vmatprep.subr.bf16.mxu0 %v302_v0  ;;  %275 = vmatprep.subr.bf16.mxu1 %v302_v0 }
  0x13   :  { %244 = vmatpush3.bf16.msra.mxu0 %v293_v5  ;;  %283 = vmatpush3.bf16.msra.mxu1 %v293_v5 }
  0x14   :  { %245 = vmatprep.subr.bf16.mxu0 %v302_v0  ;;  %276 = vmatprep.subr.bf16.mxu1 %v302_v0 }
  0x17   :  { %246 = vmatpush3.bf16.msra.mxu0 %v294_v6  ;;  %284 = vmatpush3.bf16.msra.mxu1 %v294_v6 }
  0x18   :  { %247 = vmatprep.subr.bf16.mxu0 %v302_v0  ;;  %277 = vmatprep.subr.bf16.mxu1 %v302_v0 }
  0x1b   :  { %248 = vmatpush3.bf16.msra.mxu0 %v295_v7  ;;  %285 = vmatpush3.bf16.msra.mxu1 %v295_v7 }
  0x1c   :  { %249 = vmatprep.subr.bf16.mxu0 %v302_v0  ;;  %278 = vmatprep.subr.bf16.mxu1 %v302_v0 }
  0x1f   :  { %250 = vmatpush3.bf16.msra.mxu0 %v296_v8  ;;  %286 = vmatpush3.bf16.msra.mxu1 %v296_v8 }
  0x22   :  { %252 = vmatmul.mubr.bf16.vlgmr.msra.gmra.mxu0 %v297_v9  ;;  %264 = vmatmul.mubr.bf16.vlgmr.msra.gmra.mxu1 %v298_v10 }
  0x23   :  { %255 = vmatprep.mubr.msk.bf16.mxu0 %vm303_vm0, %v302_v0  ;;  %267 = vmatprep.mubr.msk.bf16.mxu1 %vm303_vm0, %v302_v0 }
  0x2a   :  { %256 = vmatmul.mubr.bf16.gmra.mxu0 %v299_v11  ;;  %268 = vmatmul.mubr.bf16.gmra.mxu1 %v300_v12 }
  0x2b   :  { %259 = vmatprep.mubr.msk.bf16.mxu0 %vm303_vm0, %v302_v0 }
  0x32   :  { %260 = vmatmul.mubr.bf16.gmra.mxu0 %v301_v13 }
  0xe2   :  { %v157_v15 = vpop.f32.mrf.mxu0  ;;  %v181_v16 = vpop.f32.mrf.mxu1 }
  0xe3   :  { %v158_v17 = vadd.f32 %v208_v14, %v157_v15  ;;  %v182_v18 = vadd.f32 %v208_v14, %v181_v16 }
  0xe4   :  { %v253_v19 = vpop.f32.mrf.mxu0  ;;  %v265_v20 = vpop.f32.mrf.mxu1 }
  0xe5   :  { %195 = vst [vmem:[%s401_s3] sm:$0xff] %v158_v17  ;;  %201 = vst [vmem:[%s401_s3 + $0x30] sm:$0xff] %v182_v18 }
  0xe6   :  { %v160_v21 = vpop.f32.mrf.mxu0  ;;  %v184_v22 = vpop.f32.mrf.mxu1 }
  0xe7   :  { %v161_v23 = vadd.f32 %v208_v14, %v160_v21  ;;  %v185_v24 = vadd.f32 %v208_v14, %v184_v22 }
  0xe8   :  { %v254_v25 = vpop.f32.mrf.mxu0  ;;  %v266_v26 = vpop.f32.mrf.mxu1 }
  0xe9   :  { %196 = vst [vmem:[%s401_s3 + $0x8] sm:$0xff] %v161_v23  ;;  %202 = vst [vmem:[%s401_s3 + $0x38] sm:$0xff] %v185_v24 }
  0xea   :  { %v165_v27 = vpop.f32.mrf.mxu0  ;;  %v189_v28 = vpop.f32.mrf.mxu1 }
  0xeb   :  { %v166_v29 = vadd.f32 %v208_v14, %v165_v27  ;;  %v190_v30 = vadd.f32 %v208_v14, %v189_v28 }
  0xec   :  { %v257_v31 = vpop.f32.mrf.mxu0  ;;  %v269_v32 = vpop.f32.mrf.mxu1 }
  0xed   :  { %197 = vst [vmem:[%s401_s3 + $0x10] sm:$0xff] %v166_v29  ;;  %203 = vst [vmem:[%s401_s3 + $0x40] sm:$0xff] %v190_v30 }
  0xee   :  { %v168_v33 = vpop.f32.mrf.mxu0  ;;  %v192_v34 = vpop.f32.mrf.mxu1 }
  0xef   :  { %v169_v35 = vadd.f32 %v208_v14, %v168_v33 }
  0xf0   :  { %v258_v36 = vpop.f32.mrf.mxu0  ;;  %v270_v37 = vpop.f32.mrf.mxu1 }
  0xf1   :  { %198 = vst [vmem:[%s401_s3 + $0x18] sm:$0xff] %v169_v35 }
  0xf2   :  { %v173_v38 = vpop.f32.mrf.mxu0 }
  0xf3   :  { %v174_v39 = vadd.f32 %v208_v14, %v173_v38 }
  0xf4   :  { %v261_v40 = vpop.f32.mrf.mxu0 }
  0xf5   :  { %199 = vst [vmem:[%s401_s3 + $0x20] sm:$0xff] %v174_v39 }
  0xf6   :  { %v176_v41 = vpop.f32.mrf.mxu0 }
  0xf7   :  { %v177_v42 = vadd.f32 %v208_v14, %v176_v41 }
  0xf8   :  { %v262_v43 = vpop.f32.mrf.mxu0 }
  0xf9   :  { %200 = vst [vmem:[%s401_s3 + $0x28] sm:$0xff] %v177_v42 }

// kernel: _lambda_.3
= control target key start
LH: loop header
LB: loop body
LE: loop exit
PB: predicated region body
PF: predicated region fallthrough
CT: control target
= control target key end

     0   :  { %8 = vsyncpa [#allocation3], 0  ;;  %s599_s12 = smov [#allocation2]   ;;  %s806_s0 = inlined_call_operand.vmem [shape: bf16[72,128], index: 0, kind: input, shape index: {}]   ;;  %s807_s1 = inlined_call_operand.hbm [shape: bf16[128,512], index: 1, kind: input, shape index: {}]   ;;  %s808_s2 = inlined_call_operand.vmem [shape: f32[1,512], index: 2, kind: input, shape index: {}]   ;;  %s809_s3 = inlined_call_operand.vmem [shape: f32[72,512], index: 3, kind: output, shape index: {}]  }
   0x1   :  { %s16_s13 = sshll.u32 %s599_s12, 4  ;;  %s17_s13 = int_to_ptr.vmem [resolvable:$true] %s16_s13 }
   0x2   :  { %s585_s14 = scalar_lea.vmem %s17_s13, 4096  ;;  %p590_p1 = scmp.lt.s32.totalorder %s17_s13, %s17_s13 }
   0x3   :  { %p586_p0 = scmp.ne.s32.totalorder %s17_s13, %s585_s14  ;;  %p591_p2 = scmp.lt.s32.totalorder %s585_s14, %s585_s14 }
   0x5   :  { %p592_p3 = por %p591_p2, %p590_p1 }
   0x7   :  { %p593_p4 = pnand %p592_p3, %p586_p0 }
   0x9   :  { %596 = shalt.err (!%p593_p4)
}
   0xa   :  { %s600_s15 = smov 256   ;;  %s601_s16 = smov 16  }
   0xb   :  { %22 = dma.hbm_to_vmem [thread:$0]  %s807_s1, 4096, %s17_s13, [#allocation3], %s600_s15, %s600_s15, %s601_s16  }
   0xc   :  { %597 = dma.done.wait [#allocation3], 4096  }
   0xd   :  { %598 = vsyncadd [#allocation3], 4294963200  ;;  %v602_v0 = vmov 0   ;;  %v524_v1 = vld [vmem:[#allocation2 + $0xe4] ss:$16 sps:$4 sm:$0xff]   ;;  %v573_v34 = vld [vmem:[%s806_s0 + $0x8] sm:$0xff]   ;;  %v72_v38 = vlaneseq }
   0xe   :  { %312 = vmatprep.mubr.bf16.mxu0 %v602_v0  ;;  %393 = vmatprep.mubr.bf16.mxu1 %v602_v0  ;;  %v526_v2 = vld [vmem:[#allocation2 + $0xec] ss:$16 sps:$4 sm:$0xff]   ;;  %v528_v3 = vld [vmem:[#allocation2 + $0xe0] ss:$16 sps:$4 sm:$0xff]   ;;  %v529_v4 = vld [vmem:[#allocation2 + $0xe8] ss:$16 sps:$4 sm:$0xff]  }
   0xf   :  { %280 = vmatprep.subr.bf16.mxu0 %v524_v1  ;;  %361 = vmatprep.subr.bf16.mxu1 %v526_v2  ;;  %v530_v5 = vld [vmem:[#allocation2 + $0xc4] ss:$16 sps:$4 sm:$0xff]   ;;  %v532_v6 = vld [vmem:[#allocation2 + $0xcc] ss:$16 sps:$4 sm:$0xff]   ;;  %v534_v7 = vld [vmem:[#allocation2 + $0xc0] ss:$16 sps:$4 sm:$0xff]  }
  0x10   :  { %281 = vmatpush1.bf16.msra.mxu0 %v528_v3  ;;  %362 = vmatpush1.bf16.msra.mxu1 %v529_v4  ;;  %v535_v8 = vld [vmem:[#allocation2 + $0xc8] ss:$16 sps:$4 sm:$0xff]   ;;  %v536_v9 = vld [vmem:[#allocation2 + $0xa4] ss:$16 sps:$4 sm:$0xff]   ;;  %v538_v10 = vld [vmem:[#allocation2 + $0xac] ss:$16 sps:$4 sm:$0xff]  }
  0x11   :  { %282 = vmatprep.subr.bf16.mxu0 %v530_v5  ;;  %363 = vmatprep.subr.bf16.mxu1 %v532_v6  ;;  %v540_v11 = vld [vmem:[#allocation2 + $0xa0] ss:$16 sps:$4 sm:$0xff]   ;;  %v541_v12 = vld [vmem:[#allocation2 + $0xa8] ss:$16 sps:$4 sm:$0xff]   ;;  %v542_v13 = vld [vmem:[#allocation2 + $0x84] ss:$16 sps:$4 sm:$0xff]  }
  0x12   :  { %v544_v14 = vld [vmem:[#allocation2 + $0x8c] ss:$16 sps:$4 sm:$0xff]   ;;  %v546_v15 = vld [vmem:[#allocation2 + $0x80] ss:$16 sps:$4 sm:$0xff]   ;;  %v547_v16 = vld [vmem:[#allocation2 + $0x88] ss:$16 sps:$4 sm:$0xff]  }
  0x13   :  { %v548_v17 = vld [vmem:[#allocation2 + $0x64] ss:$16 sps:$4 sm:$0xff]   ;;  %v550_v18 = vld [vmem:[#allocation2 + $0x6c] ss:$16 sps:$4 sm:$0xff]   ;;  %v552_v19 = vld [vmem:[#allocation2 + $0x60] ss:$16 sps:$4 sm:$0xff]  }
  0x14   :  { %283 = vmatpush1.bf16.msra.mxu0 %v534_v7  ;;  %364 = vmatpush1.bf16.msra.mxu1 %v535_v8  ;;  %v553_v20 = vld [vmem:[#allocation2 + $0x68] ss:$16 sps:$4 sm:$0xff]   ;;  %v554_v21 = vld [vmem:[#allocation2 + $0x44] ss:$16 sps:$4 sm:$0xff]   ;;  %v556_v22 = vld [vmem:[#allocation2 + $0x4c] ss:$16 sps:$4 sm:$0xff]  }
  0x15   :  { %284 = vmatprep.subr.bf16.mxu0 %v536_v9  ;;  %365 = vmatprep.subr.bf16.mxu1 %v538_v10  ;;  %v558_v23 = vld [vmem:[#allocation2 + $0x40] ss:$16 sps:$4 sm:$0xff]   ;;  %v559_v24 = vld [vmem:[#allocation2 + $0x48] ss:$16 sps:$4 sm:$0xff]   ;;  %v560_v25 = vld [vmem:[#allocation2 + $0x24] ss:$16 sps:$4 sm:$0xff]  }
  0x16   :  { %v562_v26 = vld [vmem:[#allocation2 + $0x2c] ss:$16 sps:$4 sm:$0xff]   ;;  %v564_v27 = vld [vmem:[#allocation2 + $0x20] ss:$16 sps:$4 sm:$0xff]   ;;  %v565_v28 = vld [vmem:[#allocation2 + $0x28] ss:$16 sps:$4 sm:$0xff]  }
  0x17   :  { %v566_v29 = vld [vmem:[#allocation2 + $0x4] ss:$16 sps:$4 sm:$0xff]   ;;  %v568_v30 = vld [vmem:[#allocation2 + $0xc] ss:$16 sps:$4 sm:$0xff]   ;;  %v570_v31 = vld [vmem:[#allocation2] ss:$16 sps:$4 sm:$0xff]  }
  0x18   :  { %285 = vmatpush1.bf16.msra.mxu0 %v540_v11  ;;  %366 = vmatpush1.bf16.msra.mxu1 %v541_v12  ;;  %v571_v32 = vld [vmem:[#allocation2 + $0x8] ss:$16 sps:$4 sm:$0xff]   ;;  %v572_v33 = vld [vmem:[%s806_s0] sm:$0xff]   ;;  %v574_v35 = vld [vmem:[%s806_s0 + $0x10] sm:$0xff]   ;;  %v73_v39 = vshrl.u32 %v72_v38, 7 }
  0x19   :  { %286 = vmatprep.subr.bf16.mxu0 %v542_v13  ;;  %367 = vmatprep.subr.bf16.mxu1 %v544_v14  ;;  %v575_v36 = vld [vmem:[%s806_s0 + $0x18] sm:$0xff]   ;;  %v576_v37 = vld [vmem:[%s806_s0 + $0x20] ss:$0 sps:$4 sm:$0xff]  }
  0x1a   :  { %v74_v40 = vsub.s32 0, %v73_v39  ;;  %v82_v41 = vsub.s32 2, %v73_v39  ;;  %v70_v42 = vld [vmem:[%s808_s2] sm:$0xf]  ;;  %v78_v43 = vsub.s32 1, %v73_v39  ;;  %v86_v44 = vsub.s32 3, %v73_v39 }
  0x1c   :  { %287 = vmatpush1.bf16.msra.mxu0 %v546_v15  ;;  %368 = vmatpush1.bf16.msra.mxu1 %v547_v16  ;;  %v654_v45 = vrot.slane %v70_v42, %v74_v40  ;;  %v656_v46 = vrot.slane %v70_v42, %v82_v41  ;;  %v658_v47 = vrot.slane %v70_v42, %v78_v43 }
  0x1d   :  { %288 = vmatprep.subr.bf16.mxu0 %v548_v17  ;;  %369 = vmatprep.subr.bf16.mxu1 %v550_v18  ;;  %v660_v48 = vrot.slane %v70_v42, %v86_v44 }
  0x20   :  { %289 = vmatpush1.bf16.msra.mxu0 %v552_v19  ;;  %370 = vmatpush1.bf16.msra.mxu1 %v553_v20 }
  0x21   :  { %290 = vmatprep.subr.bf16.mxu0 %v554_v21  ;;  %371 = vmatprep.subr.bf16.mxu1 %v556_v22 }
  0x24   :  { %291 = vmatpush1.bf16.msra.mxu0 %v558_v23  ;;  %372 = vmatpush1.bf16.msra.mxu1 %v559_v24 }
  0x25   :  { %292 = vmatprep.subr.bf16.mxu0 %v560_v25  ;;  %373 = vmatprep.subr.bf16.mxu1 %v562_v26 }
  0x28   :  { %293 = vmatpush1.bf16.msra.mxu0 %v564_v27  ;;  %374 = vmatpush1.bf16.msra.mxu1 %v565_v28 }
  0x29   :  { %294 = vmatprep.subr.bf16.mxu0 %v566_v29  ;;  %375 = vmatprep.subr.bf16.mxu1 %v568_v30 }
  0x2c   :  { %295 = vmatpush1.bf16.msra.mxu0 %v570_v31  ;;  %376 = vmatpush1.bf16.msra.mxu1 %v571_v32 }
  0x2f   :  { %313 = vmatmul.mubr.bf16.vlgmr.msra.gmra.mxu0 %v572_v33  ;;  %394 = vmatmul.mubr.bf16.vlgmr.msra.gmra.mxu1 %v572_v33 }
  0x30   :  { %322 = vmatprep.mubr.bf16.mxu0 %v602_v0  ;;  %403 = vmatprep.mubr.bf16.mxu1 %v602_v0 }
  0x37   :  { %323 = vmatmul.mubr.bf16.gmra.mxu0 %v573_v34  ;;  %404 = vmatmul.mubr.bf16.gmra.mxu1 %v573_v34 }
  0x38   :  { %332 = vmatprep.mubr.bf16.mxu0 %v602_v0  ;;  %413 = vmatprep.mubr.bf16.mxu1 %v602_v0 }
  0x3f   :  { %333 = vmatmul.mubr.bf16.gmra.mxu0 %v574_v35  ;;  %414 = vmatmul.mubr.bf16.gmra.mxu1 %v574_v35 }
  0x40   :  { %342 = vmatprep.mubr.bf16.mxu0 %v602_v0  ;;  %423 = vmatprep.mubr.bf16.mxu1 %v602_v0 }
  0x47   :  { %343 = vmatmul.mubr.bf16.gmra.mxu0 %v575_v36  ;;  %424 = vmatmul.mubr.bf16.gmra.mxu1 %v575_v36 }
  0x48   :  { %352 = vmatprep.mubr.bf16.mxu0 %v602_v0  ;;  %433 = vmatprep.mubr.bf16.mxu1 %v602_v0 }
  0x4f   :  { %353 = vmatmul.mubr.bf16.gmra.mxu0 %v576_v37  ;;  %434 = vmatmul.mubr.bf16.gmra.mxu1 %v576_v37 }
  0xef   :  { %v314_v49 = vpop.f32.mrf.mxu0  ;;  %v395_v50 = vpop.f32.mrf.mxu1 }
  0xf0   :  { %v315_v51 = vadd.f32 %v314_v49, %v654_v45  ;;  %v396_v52 = vadd.f32 %v395_v50, %v656_v46 }
  0xf1   :  { %v316_v53 = vpop.f32.mrf.mxu0  ;;  %v397_v54 = vpop.f32.mrf.mxu1 }
  0xf2   :  { %442 = vst [vmem:[%s809_s3] sm:$0xff] %v315_v51  ;;  %444 = vst [vmem:[%s809_s3 + $0x10] sm:$0xff] %v396_v52  ;;  %v317_v55 = vadd.f32 %v316_v53, %v658_v47  ;;  %v398_v56 = vadd.f32 %v397_v54, %v660_v48 }
  0xf3   :  { %v318_v57 = vpop.f32.mrf.mxu0  ;;  %v399_v58 = vpop.f32.mrf.mxu1 }
  0xf4   :  { %443 = vst [vmem:[%s809_s3 + $0x8] sm:$0xff] %v317_v55  ;;  %445 = vst [vmem:[%s809_s3 + $0x18] sm:$0xff] %v398_v56  ;;  %v319_v59 = vadd.f32 %v318_v57, %v654_v45  ;;  %v400_v60 = vadd.f32 %v399_v58, %v656_v46 }
  0xf5   :  { %v320_v61 = vpop.f32.mrf.mxu0  ;;  %v401_v62 = vpop.f32.mrf.mxu1 }
  0xf6   :  { %446 = vst [vmem:[%s809_s3 + $0x20] sm:$0xff] %v319_v59  ;;  %448 = vst [vmem:[%s809_s3 + $0x30] sm:$0xff] %v400_v60  ;;  %v321_v63 = vadd.f32 %v320_v61, %v658_v47  ;;  %v402_v0 = vadd.f32 %v401_v62, %v660_v48 }
  0xf7   :  { %v324_v1 = vpop.f32.mrf.mxu0  ;;  %v405_v2 = vpop.f32.mrf.mxu1 }
  0xf8   :  { %447 = vst [vmem:[%s809_s3 + $0x28] sm:$0xff] %v321_v63  ;;  %449 = vst [vmem:[%s809_s3 + $0x38] sm:$0xff] %v402_v0  ;;  %v325_v3 = vadd.f32 %v324_v1, %v654_v45  ;;  %v406_v4 = vadd.f32 %v405_v2, %v656_v46 }
  0xf9   :  { %v326_v5 = vpop.f32.mrf.mxu0  ;;  %v407_v6 = vpop.f32.mrf.mxu1 }
  0xfa   :  { %450 = vst [vmem:[%s809_s3 + $0x40] sm:$0xff] %v325_v3  ;;  %452 = vst [vmem:[%s809_s3 + $0x50] sm:$0xff] %v406_v4  ;;  %v327_v7 = vadd.f32 %v326_v5, %v658_v47  ;;  %v408_v8 = vadd.f32 %v407_v6, %v660_v48 }
  0xfb   :  { %v328_v9 = vpop.f32.mrf.mxu0  ;;  %v409_v10 = vpop.f32.mrf.mxu1 }
  0xfc   :  { %451 = vst [vmem:[%s809_s3 + $0x48] sm:$0xff] %v327_v7  ;;  %453 = vst [vmem:[%s809_s3 + $0x58] sm:$0xff] %v408_v8  ;;  %v329_v11 = vadd.f32 %v328_v9, %v654_v45  ;;  %v410_v12 = vadd.f32 %v409_v10, %v656_v46 }
  0xfd   :  { %v330_v13 = vpop.f32.mrf.mxu0  ;;  %v411_v14 = vpop.f32.mrf.mxu1 }
  0xfe   :  { %454 = vst [vmem:[%s809_s3 + $0x60] sm:$0xff] %v329_v11  ;;  %456 = vst [vmem:[%s809_s3 + $0x70] sm:$0xff] %v410_v12  ;;  %v331_v15 = vadd.f32 %v330_v13, %v658_v47  ;;  %v412_v16 = vadd.f32 %v411_v14, %v660_v48 }
  0xff   :  { %v334_v17 = vpop.f32.mrf.mxu0  ;;  %v415_v18 = vpop.f32.mrf.mxu1 }
 0x100   :  { %455 = vst [vmem:[%s809_s3 + $0x68] sm:$0xff] %v331_v15  ;;  %457 = vst [vmem:[%s809_s3 + $0x78] sm:$0xff] %v412_v16  ;;  %v335_v19 = vadd.f32 %v334_v17, %v654_v45  ;;  %v416_v20 = vadd.f32 %v415_v18, %v656_v46 }
 0x101   :  { %v336_v21 = vpop.f32.mrf.mxu0  ;;  %v417_v22 = vpop.f32.mrf.mxu1 }
 0x102   :  { %458 = vst [vmem:[%s809_s3 + $0x80] sm:$0xff] %v335_v19  ;;  %460 = vst [vmem:[%s809_s3 + $0x90] sm:$0xff] %v416_v20  ;;  %v337_v23 = vadd.f32 %v336_v21, %v658_v47  ;;  %v418_v24 = vadd.f32 %v417_v22, %v660_v48 }
 0x103   :  { %v338_v25 = vpop.f32.mrf.mxu0  ;;  %v419_v26 = vpop.f32.mrf.mxu1 }
 0x104   :  { %459 = vst [vmem:[%s809_s3 + $0x88] sm:$0xff] %v337_v23  ;;  %461 = vst [vmem:[%s809_s3 + $0x98] sm:$0xff] %v418_v24  ;;  %v339_v27 = vadd.f32 %v338_v25, %v654_v45  ;;  %v420_v28 = vadd.f32 %v419_v26, %v656_v46 }
 0x105   :  { %v340_v29 = vpop.f32.mrf.mxu0  ;;  %v421_v30 = vpop.f32.mrf.mxu1 }
 0x106   :  { %462 = vst [vmem:[%s809_s3 + $0xa0] sm:$0xff] %v339_v27  ;;  %464 = vst [vmem:[%s809_s3 + $0xb0] sm:$0xff] %v420_v28  ;;  %v341_v31 = vadd.f32 %v340_v29, %v658_v47  ;;  %v422_v32 = vadd.f32 %v421_v30, %v660_v48 }
 0x107   :  { %v344_v33 = vpop.f32.mrf.mxu0  ;;  %v425_v34 = vpop.f32.mrf.mxu1 }
 0x108   :  { %463 = vst [vmem:[%s809_s3 + $0xa8] sm:$0xff] %v341_v31  ;;  %465 = vst [vmem:[%s809_s3 + $0xb8] sm:$0xff] %v422_v32  ;;  %v345_v35 = vadd.f32 %v344_v33, %v654_v45  ;;  %v426_v36 = vadd.f32 %v425_v34, %v656_v46 }
 0x109   :  { %v346_v37 = vpop.f32.mrf.mxu0  ;;  %v427_v38 = vpop.f32.mrf.mxu1 }
 0x10a   :  { %466 = vst [vmem:[%s809_s3 + $0xc0] sm:$0xff] %v345_v35  ;;  %468 = vst [vmem:[%s809_s3 + $0xd0] sm:$0xff] %v426_v36  ;;  %v347_v39 = vadd.f32 %v346_v37, %v658_v47  ;;  %v428_v40 = vadd.f32 %v427_v38, %v660_v48 }
 0x10b   :  { %v348_v41 = vpop.f32.mrf.mxu0  ;;  %v429_v42 = vpop.f32.mrf.mxu1 }
 0x10c   :  { %467 = vst [vmem:[%s809_s3 + $0xc8] sm:$0xff] %v347_v39  ;;  %469 = vst [vmem:[%s809_s3 + $0xd8] sm:$0xff] %v428_v40  ;;  %v349_v43 = vadd.f32 %v348_v41, %v654_v45  ;;  %v430_v44 = vadd.f32 %v429_v42, %v656_v46 }
 0x10d   :  { %v350_v49 = vpop.f32.mrf.mxu0  ;;  %v431_v50 = vpop.f32.mrf.mxu1 }
 0x10e   :  { %470 = vst [vmem:[%s809_s3 + $0xe0] sm:$0xff] %v349_v43  ;;  %472 = vst [vmem:[%s809_s3 + $0xf0] sm:$0xff] %v430_v44  ;;  %v351_v51 = vadd.f32 %v350_v49, %v658_v47  ;;  %v432_v52 = vadd.f32 %v431_v50, %v660_v48 }
 0x10f   :  { %v354_v53 = vpop.f32.mrf.mxu0  ;;  %v435_v54 = vpop.f32.mrf.mxu1 }
 0x110   :  { %471 = vst [vmem:[%s809_s3 + $0xe8] sm:$0xff] %v351_v51  ;;  %473 = vst [vmem:[%s809_s3 + $0xf8] sm:$0xff] %v432_v52  ;;  %v355_v55 = vadd.f32 %v354_v53, %v654_v45  ;;  %v436_v56 = vadd.f32 %v435_v54, %v656_v46 }
 0x111   :  { %v356_v57 = vpop.f32.mrf.mxu0  ;;  %v437_v58 = vpop.f32.mrf.mxu1 }
 0x112   :  { %474 = vst [vmem:[%s809_s3 + $0x100] sm:$0xff] %v355_v55  ;;  %476 = vst [vmem:[%s809_s3 + $0x110] sm:$0xff] %v436_v56  ;;  %v357_v59 = vadd.f32 %v356_v57, %v658_v47  ;;  %v438_v60 = vadd.f32 %v437_v58, %v660_v48 }
 0x113   :  { %v358_v61 = vpop.f32.mrf.mxu0  ;;  %v439_v62 = vpop.f32.mrf.mxu1 }
 0x114   :  { %475 = vst [vmem:[%s809_s3 + $0x108] sm:$0xff] %v357_v59  ;;  %477 = vst [vmem:[%s809_s3 + $0x118] sm:$0xff] %v438_v60 }
 0x115   :  { %v359_v45 = vpop.f32.mrf.mxu0  ;;  %v440_v46 = vpop.f32.mrf.mxu1 }
 0x116   :  { %482 = vsyncpa [#allocation3], 1 }

// kernel: _lambda_.4
= control target key start
LH: loop header
LB: loop body
LE: loop exit
PB: predicated region body
PF: predicated region fallthrough
CT: control target
= control target key end

     0   :  { %v3448_v1 = vmov 0   ;;  %s4319_s1 = inlined_call_operand.vmem [shape: bf16[128,512], index: 1, kind: input, shape index: {}]   ;;  %s4320_s0 = inlined_call_operand.vmem [shape: f32[9,8,512], index: 0, kind: input, shape index: {}]   ;;  %s4321_s2 = inlined_call_operand.vmem [shape: bf16[9,8,128], index: 2, kind: output, shape index: {}]  }
   0x1   :  { %v3467_v0 = vld [vmem:[%s4319_s1 + $0xe4] ss:$16 sps:$4 sm:$0xff]   ;;  %240 = vmatprep.mubr.bf16.mxu0 %v3448_v1  ;;  %281 = vmatprep.mubr.bf16.mxu1 %v3448_v1  ;;  %v3474_v2 = vld [vmem:[%s4319_s1 + $0xe0] ss:$16 sps:$4 sm:$0xff]   ;;  %v3497_v6 = vld [vmem:[%s4319_s1 + $0xec] ss:$16 sps:$4 sm:$0xff]  }
   0x2   :  { %208 = vmatprep.subr.bf16.mxu0 %v3467_v0  ;;  %v3480_v3 = vld [vmem:[%s4319_s1 + $0xc4] ss:$16 sps:$4 sm:$0xff]   ;;  %v3486_v4 = vld [vmem:[%s4319_s1 + $0xc0] ss:$16 sps:$4 sm:$0xff]   ;;  %v3502_v7 = vld [vmem:[%s4319_s1 + $0xe8] ss:$16 sps:$4 sm:$0xff]   ;;  %249 = vmatprep.subr.bf16.mxu1 %v3497_v6 }
   0x3   :  { %209 = vmatpush1.bf16.msra.mxu0 %v3474_v2  ;;  %v3492_v5 = vld [vmem:[%s4319_s1 + $0xa4] ss:$16 sps:$4 sm:$0xff]   ;;  %v3508_v8 = vld [vmem:[%s4319_s1 + $0xa0] ss:$16 sps:$4 sm:$0xff]   ;;  %250 = vmatpush1.bf16.msra.mxu1 %v3502_v7  ;;  %v3521_v10 = vld [vmem:[%s4319_s1 + $0xcc] ss:$16 sps:$4 sm:$0xff]  }
   0x4   :  { %210 = vmatprep.subr.bf16.mxu0 %v3480_v3  ;;  %v3515_v9 = vld [vmem:[%s4319_s1 + $0x84] ss:$16 sps:$4 sm:$0xff]   ;;  %v3526_v11 = vld [vmem:[%s4319_s1 + $0xc8] ss:$16 sps:$4 sm:$0xff]   ;;  %251 = vmatprep.subr.bf16.mxu1 %v3521_v10  ;;  %v3533_v12 = vld [vmem:[%s4319_s1 + $0x80] ss:$16 sps:$4 sm:$0xff]  }
   0x5   :  { %v3538_v13 = vld [vmem:[%s4319_s1 + $0x64] ss:$16 sps:$4 sm:$0xff]   ;;  %v3543_v14 = vld [vmem:[%s4319_s1 + $0xac] ss:$16 sps:$4 sm:$0xff]   ;;  %v3550_v15 = vld [vmem:[%s4319_s1 + $0xa8] ss:$16 sps:$4 sm:$0xff]  }
   0x6   :  { %v3556_v16 = vld [vmem:[%s4319_s1 + $0x8c] ss:$16 sps:$4 sm:$0xff]   ;;  %v3562_v17 = vld [vmem:[%s4319_s1 + $0x60] ss:$16 sps:$4 sm:$0xff]   ;;  %v3568_v18 = vld [vmem:[%s4319_s1 + $0x44] ss:$16 sps:$4 sm:$0xff]  }
   0x7   :  { %211 = vmatpush1.bf16.msra.mxu0 %v3486_v4  ;;  %252 = vmatpush1.bf16.msra.mxu1 %v3526_v11  ;;  %v3574_v19 = vld [vmem:[%s4319_s1 + $0x88] ss:$16 sps:$4 sm:$0xff]   ;;  %v3580_v20 = vld [vmem:[%s4319_s1 + $0x6c] ss:$16 sps:$4 sm:$0xff]   ;;  %v3586_v21 = vld [vmem:[%s4319_s1 + $0x40] ss:$16 sps:$4 sm:$0xff]  }
   0x8   :  { %212 = vmatprep.subr.bf16.mxu0 %v3492_v5  ;;  %253 = vmatprep.subr.bf16.mxu1 %v3543_v14  ;;  %v3591_v22 = vld [vmem:[%s4319_s1 + $0x24] ss:$16 sps:$4 sm:$0xff]   ;;  %v3598_v23 = vld [vmem:[%s4319_s1 + $0x68] ss:$16 sps:$4 sm:$0xff]   ;;  %v3603_v24 = vld [vmem:[%s4319_s1 + $0x20] ss:$16 sps:$4 sm:$0xff]  }
   0x9   :  { %v3609_v25 = vld [vmem:[%s4319_s1 + $0x4c] ss:$16 sps:$4 sm:$0xff]   ;;  %v3614_v26 = vld [vmem:[%s4319_s1 + $0x4] ss:$16 sps:$4 sm:$0xff]   ;;  %v3619_v27 = vld [vmem:[%s4319_s1 + $0x48] ss:$16 sps:$4 sm:$0xff]  }
   0xa   :  { %v3625_v28 = vld [vmem:[%s4319_s1 + $0x2c] ss:$16 sps:$4 sm:$0xff]   ;;  %v3632_v29 = vld [vmem:[%s4319_s1] ss:$16 sps:$4 sm:$0xff]   ;;  %v3638_v30 = vld [vmem:[%s4319_s1 + $0x28] ss:$16 sps:$4 sm:$0xff]  }
   0xb   :  { %213 = vmatpush1.bf16.msra.mxu0 %v3508_v8  ;;  %254 = vmatpush1.bf16.msra.mxu1 %v3550_v15  ;;  %v3644_v31 = vld [vmem:[%s4319_s1 + $0xc] ss:$16 sps:$4 sm:$0xff]   ;;  %v3652_v32 = vld [vmem:[%s4319_s1 + $0x8] ss:$16 sps:$4 sm:$0xff]   ;;  %v12_v33 = vld [vmem:[%s4320_s0] sm:$0xff] }
   0xc   :  { %214 = vmatprep.subr.bf16.mxu0 %v3515_v9  ;;  %255 = vmatprep.subr.bf16.mxu1 %v3556_v16  ;;  %v13_v35 = vld [vmem:[%s4320_s0 + $0x8] sm:$0xff]  ;;  %v15_v45 = vld [vmem:[%s4320_s0 + $0x18] sm:$0xff]  ;;  %v14_v48 = vld [vmem:[%s4320_s0 + $0x10] sm:$0xff] }
   0xf   :  { %215 = vmatpush1.bf16.msra.mxu0 %v3533_v12  ;;  %256 = vmatpush1.bf16.msra.mxu1 %v3574_v19 }
  0x10   :  { %216 = vmatprep.subr.bf16.mxu0 %v3538_v13  ;;  %257 = vmatprep.subr.bf16.mxu1 %v3580_v20 }
  0x13   :  { %217 = vmatpush1.bf16.msra.mxu0 %v3562_v17  ;;  %258 = vmatpush1.bf16.msra.mxu1 %v3598_v23 }
  0x14   :  { %218 = vmatprep.subr.bf16.mxu0 %v3568_v18  ;;  %259 = vmatprep.subr.bf16.mxu1 %v3609_v25 }
  0x17   :  { %219 = vmatpush1.bf16.msra.mxu0 %v3586_v21  ;;  %260 = vmatpush1.bf16.msra.mxu1 %v3619_v27 }
  0x18   :  { %220 = vmatprep.subr.bf16.mxu0 %v3591_v22  ;;  %261 = vmatprep.subr.bf16.mxu1 %v3625_v28 }
  0x1b   :  { %221 = vmatpush1.bf16.msra.mxu0 %v3603_v24  ;;  %262 = vmatpush1.bf16.msra.mxu1 %v3638_v30 }
  0x1c   :  { %222 = vmatprep.subr.bf16.mxu0 %v3614_v26  ;;  %263 = vmatprep.subr.bf16.mxu1 %v3644_v31 }
  0x1f   :  { %223 = vmatpush1.bf16.msra.mxu0 %v3632_v29  ;;  %264 = vmatpush1.bf16.msra.mxu1 %v3652_v32 }
  0x20   :  { %517 = vmatprep.subr.bf16.mxu0 %v3467_v0  ;;  %558 = vmatprep.subr.bf16.mxu1 %v3497_v6 }
  0x22   :  { %241 = vmatmul.mubr.bf16.vlgmr.msra.gmra.mxu0 %v3448_v1  ;;  %282 = vmatmul.mubr.bf16.vlgmr.msra.gmra.mxu1 %v3448_v1 }
  0x23   :  { %518 = vmatpush1.bf16.msra.mxu0 %v3474_v2  ;;  %549 = vmatprep.mubr.bf16.mxu0 %v3448_v1 }
  0x24   :  { %519 = vmatprep.subr.bf16.mxu0 %v3480_v3  ;;  %559 = vmatpush1.bf16.msra.mxu1 %v3502_v7 }
  0x25   :  { %560 = vmatprep.subr.bf16.mxu1 %v3521_v10  ;;  %590 = vmatprep.mubr.bf16.mxu1 %v3448_v1 }
  0x27   :  { %520 = vmatpush1.bf16.msra.mxu0 %v3486_v4 }
  0x28   :  { %521 = vmatprep.subr.bf16.mxu0 %v3492_v5  ;;  %561 = vmatpush1.bf16.msra.mxu1 %v3526_v11 }
  0x29   :  { %562 = vmatprep.subr.bf16.mxu1 %v3543_v14 }
  0x2b   :  { %522 = vmatpush1.bf16.msra.mxu0 %v3508_v8 }
  0x2c   :  { %523 = vmatprep.subr.bf16.mxu0 %v3515_v9  ;;  %563 = vmatpush1.bf16.msra.mxu1 %v3550_v15 }
  0x2d   :  { %564 = vmatprep.subr.bf16.mxu1 %v3556_v16 }
  0x2f   :  { %524 = vmatpush1.bf16.msra.mxu0 %v3533_v12 }
  0x30   :  { %525 = vmatprep.subr.bf16.mxu0 %v3538_v13  ;;  %565 = vmatpush1.bf16.msra.mxu1 %v3574_v19 }
  0x31   :  { %566 = vmatprep.subr.bf16.mxu1 %v3580_v20 }
  0x33   :  { %526 = vmatpush1.bf16.msra.mxu0 %v3562_v17 }
  0x34   :  { %527 = vmatprep.subr.bf16.mxu0 %v3568_v18  ;;  %567 = vmatpush1.bf16.msra.mxu1 %v3598_v23 }
  0x35   :  { %568 = vmatprep.subr.bf16.mxu1 %v3609_v25 }
  0x37   :  { %528 = vmatpush1.bf16.msra.mxu0 %v3586_v21 }
  0x38   :  { %529 = vmatprep.subr.bf16.mxu0 %v3591_v22  ;;  %569 = vmatpush1.bf16.msra.mxu1 %v3619_v27 }
  0x39   :  { %570 = vmatprep.subr.bf16.mxu1 %v3625_v28 }
  0x3b   :  { %530 = vmatpush1.bf16.msra.mxu0 %v3603_v24 }
  0x3c   :  { %531 = vmatprep.subr.bf16.mxu0 %v3614_v26  ;;  %571 = vmatpush1.bf16.msra.mxu1 %v3638_v30 }
  0x3d   :  { %572 = vmatprep.subr.bf16.mxu1 %v3644_v31 }
  0x3f   :  { %532 = vmatpush1.bf16.msra.mxu0 %v3632_v29 }
  0x40   :  { %827 = vmatprep.subr.bf16.mxu0 %v3467_v0  ;;  %573 = vmatpush1.bf16.msra.mxu1 %v3652_v32 }
  0x41   :  { %868 = vmatprep.subr.bf16.mxu1 %v3497_v6 }
  0xe2   :  { %v242_v34 = vpop.f32.mrf.mxu0  ;;  %v283_v42 = vpop.f32.mrf.mxu1 }
  0xe3   :  { %v290_v36 = vadd.f32 %v242_v34, %v12_v33  ;;  %v292_v50 = vadd.f32 %v283_v42, %v14_v48 }
  0xe4   :  { %v244_v37 = vpop.f32.mrf.mxu0  ;;  %v285_v44 = vpop.f32.mrf.mxu1 }
  0xe5   :  { %v2836_v38 = vmul.f32 -1.442695, %v290_v36  ;;  %v291_v39 = vadd.f32 %v244_v37, %v13_v35  ;;  %v293_v49 = vadd.f32 %v285_v44, %v15_v45  ;;  %v2839_v37 = vld [vmem:[%s4320_s0 + $0x20] sm:$0xff] }
  0xe6   :  { %v246_v40 = vpop.f32.mrf.mxu0  ;;  %v287_v46 = vpop.f32.mrf.mxu1 }
  0xe7   :  { %3304 = vpow2.f32 %v2836_v38  ;;  %v2837_v41 = vmul.f32 -1.442695, %v291_v39  ;;  %v2838_v51 = vmul.f32 -1.442695, %v293_v49  ;;  %v2840_v40 = vld [vmem:[%s4320_s0 + $0x28] sm:$0xff]  ;;  %v2842_v49 = vld [vmem:[%s4320_s0 + $0x38] sm:$0xff] }
  0xe8   :  { %v247_v43 = vpop.f32.mrf.mxu0  ;;  %v288_v47 = vpop.f32.mrf.mxu1 }
  0xe9   :  { %3306 = vpow2.f32 %v2837_v41 }
  0xea   :  { %3308 = vtanh.f32 %v292_v50 }
  0xeb   :  { %3310 = vpow2.f32 %v2838_v51  ;;  %v2841_v51 = vld [vmem:[%s4320_s0 + $0x30] sm:$0xff] }
  0xf4   :  { %v3305_v52 = vpop.eup %3304 }
  0xf5   :  { %v297_v53 = vadd.f32 1.0, %v3305_v52 }
  0xf6   :  { %v3307_v54 = vpop.eup %3306 }
  0xf7   :  { %3312 = vrcp.f32 %v297_v53  ;;  %v303_v55 = vadd.f32 1.0, %v3307_v54  ;;  %v3309_v56 = vpop.eup %3308 }
  0xf8   :  { %v3311_v57 = vpop.eup %3310 }
  0xf9   :  { %3314 = vrcp.f32 %v303_v55  ;;  %v310_v60 = vadd.f32 1.0, %v3311_v57 }
  0xfb   :  { %3316 = vrcp.f32 %v310_v60 }
 0x104   :  { %v3313_v58 = vpop.eup %3312 }
 0x105   :  { %v314_v62 = vmul.f32 %v3313_v58, %v3309_v56 }
 0x106   :  { %v3315_v59 = vpop.eup %3314 }
 0x107   :  { %v313_v61 = vmul.f32 0.0, %v3315_v59 }
 0x108   :  { %v3317_v33 = vpop.eup %3316 }
 0x109   :  { %v3708_v63 = vadd.f32 %v314_v62, %v313_v61 }
 0x10b   :  { %3318 = vtanh.f32 %v3708_v63 }
 0x118   :  { %v3319_v34 = vpop.eup %3318 }
 0x119   :  { %v317_v35 = vmul.f32 %v3319_v34, %v3317_v33 }
 0x11b   :  { %v318_v36 = vpack.c.bf16 %v317_v35, %v317_v35 }
 0x11d   :  { %319 = vst [vmem:[%s4321_s2] sm:$0xf] %v318_v36  ;;  %550 = vmatmul.mubr.bf16.vlgmr.msra.gmra.mxu0 %v318_v36  ;;  %591 = vmatmul.mubr.bf16.vlgmr.msra.gmra.mxu1 %v318_v36 }
 0x11e   :  { %828 = vmatpush1.bf16.msra.mxu0 %v3474_v2  ;;  %869 = vmatpush1.bf16.msra.mxu1 %v3502_v7 }
 0x11f   :  { %829 = vmatprep.subr.bf16.mxu0 %v3480_v3  ;;  %870 = vmatprep.subr.bf16.mxu1 %v3521_v10 }
 0x120   :  { %859 = vmatprep.mubr.bf16.mxu0 %v3448_v1  ;;  %900 = vmatprep.mubr.bf16.mxu1 %v3448_v1 }
 0x122   :  { %830 = vmatpush1.bf16.msra.mxu0 %v3486_v4  ;;  %871 = vmatpush1.bf16.msra.mxu1 %v3526_v11 }
 0x123   :  { %831 = vmatprep.subr.bf16.mxu0 %v3492_v5  ;;  %872 = vmatprep.subr.bf16.mxu1 %v3543_v14 }
 0x126   :  { %832 = vmatpush1.bf16.msra.mxu0 %v3508_v8  ;;  %873 = vmatpush1.bf16.msra.mxu1 %v3550_v15 }
 0x127   :  { %833 = vmatprep.subr.bf16.mxu0 %v3515_v9  ;;  %874 = vmatprep.subr.bf16.mxu1 %v3556_v16 }
 0x12a   :  { %834 = vmatpush1.bf16.msra.mxu0 %v3533_v12  ;;  %875 = vmatpush1.bf16.msra.mxu1 %v3574_v19 }
 0x12b   :  { %835 = vmatprep.subr.bf16.mxu0 %v3538_v13  ;;  %876 = vmatprep.subr.bf16.mxu1 %v3580_v20 }
 0x12e   :  { %836 = vmatpush1.bf16.msra.mxu0 %v3562_v17  ;;  %877 = vmatpush1.bf16.msra.mxu1 %v3598_v23 }
 0x12f   :  { %837 = vmatprep.subr.bf16.mxu0 %v3568_v18  ;;  %878 = vmatprep.subr.bf16.mxu1 %v3609_v25 }
 0x132   :  { %838 = vmatpush1.bf16.msra.mxu0 %v3586_v21  ;;  %879 = vmatpush1.bf16.msra.mxu1 %v3619_v27 }
 0x133   :  { %839 = vmatprep.subr.bf16.mxu0 %v3591_v22  ;;  %880 = vmatprep.subr.bf16.mxu1 %v3625_v28 }
 0x136   :  { %840 = vmatpush1.bf16.msra.mxu0 %v3603_v24  ;;  %881 = vmatpush1.bf16.msra.mxu1 %v3638_v30 }
 0x137   :  { %841 = vmatprep.subr.bf16.mxu0 %v3614_v26  ;;  %882 = vmatprep.subr.bf16.mxu1 %v3644_v31 }
 0x13a   :  { %842 = vmatpush1.bf16.msra.mxu0 %v3632_v29  ;;  %883 = vmatpush1.bf16.msra.mxu1 %v3652_v32 }
 0x13b   :  { %1137 = vmatprep.subr.bf16.mxu0 %v3467_v0  ;;  %1178 = vmatprep.subr.bf16.mxu1 %v3497_v6 }
 0x1dd   :  { %v551_v38 = vpop.f32.mrf.mxu0  ;;  %v592_v39 = vpop.f32.mrf.mxu1 }
 0x1de   :  { %v599_v41 = vadd.f32 %v2839_v37, %v551_v38  ;;  %v601_v54 = vadd.f32 %v2841_v51, %v592_v39  ;;  %v3876_v51 = vld [vmem:[%s4319_s1 + $0xac] ss:$16 sps:$4 sm:$0xff]  }
 0x1df   :  { %v553_v42 = vpop.f32.mrf.mxu0  ;;  %v594_v43 = vpop.f32.mrf.mxu1 }
 0x1e0   :  { %v2875_v44 = vmul.f32 -1.442695, %v599_v41  ;;  %v600_v45 = vadd.f32 %v2840_v40, %v553_v42  ;;  %v602_v50 = vadd.f32 %v2842_v49, %v594_v43  ;;  %v3862_v49 = vld [vmem:[%s4319_s1 + $0xc8] ss:$16 sps:$4 sm:$0xff]  }
 0x1e1   :  { %v555_v46 = vpop.f32.mrf.mxu0  ;;  %v596_v47 = vpop.f32.mrf.mxu1 }
 0x1e2   :  { %3320 = vpow2.f32 %v2875_v44  ;;  %v2876_v0 = vmul.f32 -1.442695, %v600_v45  ;;  %v2877_v52 = vmul.f32 -1.442695, %v602_v50  ;;  %v3823_v44 = vld [vmem:[%s4319_s1 + $0xe4] ss:$16 sps:$4 sm:$0xff]  }
 0x1e3   :  { %v556_v6 = vpop.f32.mrf.mxu0  ;;  %v597_v48 = vpop.f32.mrf.mxu1  ;;  %v3828_v45 = vld [vmem:[%s4319_s1 + $0xec] ss:$16 sps:$4 sm:$0xff]   ;;  %v3833_v46 = vld [vmem:[%s4319_s1 + $0xe0] ss:$16 sps:$4 sm:$0xff]   ;;  %v3838_v47 = vld [vmem:[%s4319_s1 + $0xe8] ss:$16 sps:$4 sm:$0xff]  }
 0x1e4   :  { %3322 = vpow2.f32 %v2876_v0  ;;  %v3847_v0 = vld [vmem:[%s4319_s1 + $0xc4] ss:$16 sps:$4 sm:$0xff]   ;;  %v3852_v6 = vld [vmem:[%s4319_s1 + $0xcc] ss:$16 sps:$4 sm:$0xff]   ;;  %v3857_v48 = vld [vmem:[%s4319_s1 + $0xc0] ss:$16 sps:$4 sm:$0xff]  }
 0x1e5   :  { %3324 = vpow2.f32 %v2877_v52  ;;  %v3871_v50 = vld [vmem:[%s4319_s1 + $0xa4] ss:$16 sps:$4 sm:$0xff]   ;;  %v3881_v52 = vld [vmem:[%s4319_s1 + $0xa0] ss:$16 sps:$4 sm:$0xff]  }
 0x1ef   :  { %v3321_v53 = vpop.eup %3320 }
 0x1f0   :  { %v606_v55 = vadd.f32 1.0, %v3321_v53  ;;  %v3886_v53 = vld [vmem:[%s4319_s1 + $0xa8] ss:$16 sps:$4 sm:$0xff]  }
 0x1f1   :  { %v3323_v56 = vpop.eup %3322 }
 0x1f2   :  { %3326 = vrcp.f32 %v606_v55  ;;  %v612_v57 = vadd.f32 1.0, %v3323_v56  ;;  %v3325_v58 = vpop.eup %3324  ;;  %v3900_v55 = vld [vmem:[%s4319_s1 + $0x8c] ss:$16 sps:$4 sm:$0xff]   ;;  %v3905_v56 = vld [vmem:[%s4319_s1 + $0x80] ss:$16 sps:$4 sm:$0xff]  }
 0x1f3   :  { %3328 = vtanh.f32 %v601_v54  ;;  %v619_v62 = vadd.f32 1.0, %v3325_v58  ;;  %v3895_v54 = vld [vmem:[%s4319_s1 + $0x84] ss:$16 sps:$4 sm:$0xff]  }
 0x1f4   :  { %3330 = vrcp.f32 %v612_v57  ;;  %v3910_v57 = vld [vmem:[%s4319_s1 + $0x88] ss:$16 sps:$4 sm:$0xff]   ;;  %v3917_v58 = vld [vmem:[%s4319_s1 + $0x64] ss:$16 sps:$4 sm:$0xff]  }
 0x1f5   :  { %3332 = vrcp.f32 %v619_v62  ;;  %v3941_v62 = vld [vmem:[%s4319_s1 + $0x44] ss:$16 sps:$4 sm:$0xff]  }
 0x1ff   :  { %v3327_v59 = vpop.eup %3326 }
 0x200   :  { %v3329_v60 = vpop.eup %3328 }
 0x201   :  { %v3331_v61 = vpop.eup %3330  ;;  %v623_v33 = vmul.f32 %v3329_v60, %v3327_v59  ;;  %v3922_v59 = vld [vmem:[%s4319_s1 + $0x6c] ss:$16 sps:$4 sm:$0xff]   ;;  %v3929_v60 = vld [vmem:[%s4319_s1 + $0x60] ss:$16 sps:$4 sm:$0xff]  }
 0x202   :  { %v622_v34 = vmul.f32 %v3331_v61, %v3708_v63  ;;  %v3333_v36 = vpop.eup %3332  ;;  %v3934_v61 = vld [vmem:[%s4319_s1 + $0x68] ss:$16 sps:$4 sm:$0xff]  }
 0x204   :  { %v3761_v35 = vadd.f32 %v623_v33, %v622_v34  ;;  %v3946_v33 = vld [vmem:[%s4319_s1 + $0x4c] ss:$16 sps:$4 sm:$0xff]   ;;  %v3953_v34 = vld [vmem:[%s4319_s1 + $0x40] ss:$16 sps:$4 sm:$0xff]  }
 0x206   :  { %3334 = vtanh.f32 %v3761_v35 }
 0x213   :  { %v3335_v37 = vpop.eup %3334 }
 0x214   :  { %v626_v38 = vmul.f32 %v3335_v37, %v3333_v36  ;;  %v3965_v36 = vld [vmem:[%s4319_s1 + $0x24] ss:$16 sps:$4 sm:$0xff]   ;;  %v3970_v37 = vld [vmem:[%s4319_s1 + $0x2c] ss:$16 sps:$4 sm:$0xff]  }
 0x216   :  { %v627_v39 = vpack.c.bf16 %v626_v38, %v626_v38  ;;  %v3977_v38 = vld [vmem:[%s4319_s1 + $0x20] ss:$16 sps:$4 sm:$0xff]  }
 0x218   :  { %2878 = vst [vmem:[%s4321_s2 + $0x4] sm:$0xf] %v627_v39  ;;  %860 = vmatmul.mubr.bf16.vlgmr.msra.gmra.mxu0 %v627_v39  ;;  %901 = vmatmul.mubr.bf16.vlgmr.msra.gmra.mxu1 %v627_v39  ;;  %v3982_v39 = vld [vmem:[%s4319_s1 + $0x28] ss:$16 sps:$4 sm:$0xff]  }
 0x219   :  { %1138 = vmatpush1.bf16.msra.mxu0 %v3474_v2  ;;  %1179 = vmatpush1.bf16.msra.mxu1 %v3502_v7  ;;  %v2879_v2 = vld [vmem:[%s4320_s0 + $0x40] sm:$0xff] }
 0x21a   :  { %1139 = vmatprep.subr.bf16.mxu0 %v3480_v3  ;;  %1180 = vmatprep.subr.bf16.mxu1 %v3521_v10 }
 0x21b   :  { %1169 = vmatprep.mubr.bf16.mxu0 %v3448_v1  ;;  %1210 = vmatprep.mubr.bf16.mxu1 %v3448_v1 }
 0x21d   :  { %1140 = vmatpush1.bf16.msra.mxu0 %v3486_v4  ;;  %1181 = vmatpush1.bf16.msra.mxu1 %v3526_v11 }
 0x21e   :  { %1141 = vmatprep.subr.bf16.mxu0 %v3492_v5  ;;  %1182 = vmatprep.subr.bf16.mxu1 %v3543_v14  ;;  %v2880_v5 = vld [vmem:[%s4320_s0 + $0x48] sm:$0xff] }
 0x221   :  { %1142 = vmatpush1.bf16.msra.mxu0 %v3508_v8  ;;  %1183 = vmatpush1.bf16.msra.mxu1 %v3550_v15 }
 0x222   :  { %1143 = vmatprep.subr.bf16.mxu0 %v3515_v9  ;;  %1184 = vmatprep.subr.bf16.mxu1 %v3556_v16 }
 0x225   :  { %1144 = vmatpush1.bf16.msra.mxu0 %v3533_v12  ;;  %1185 = vmatpush1.bf16.msra.mxu1 %v3574_v19  ;;  %v2881_v19 = vld [vmem:[%s4320_s0 + $0x50] sm:$0xff] }
 0x226   :  { %1145 = vmatprep.subr.bf16.mxu0 %v3538_v13  ;;  %1186 = vmatprep.subr.bf16.mxu1 %v3580_v20 }
 0x229   :  { %1146 = vmatpush1.bf16.msra.mxu0 %v3562_v17  ;;  %1187 = vmatpush1.bf16.msra.mxu1 %v3598_v23  ;;  %v2882_v17 = vld [vmem:[%s4320_s0 + $0x58] sm:$0xff] }
 0x22a   :  { %1147 = vmatprep.subr.bf16.mxu0 %v3568_v18  ;;  %1188 = vmatprep.subr.bf16.mxu1 %v3609_v25 }
 0x22d   :  { %1148 = vmatpush1.bf16.msra.mxu0 %v3586_v21  ;;  %1189 = vmatpush1.bf16.msra.mxu1 %v3619_v27 }
 0x22e   :  { %1149 = vmatprep.subr.bf16.mxu0 %v3591_v22  ;;  %1190 = vmatprep.subr.bf16.mxu1 %v3625_v28 }
 0x231   :  { %1150 = vmatpush1.bf16.msra.mxu0 %v3603_v24  ;;  %1191 = vmatpush1.bf16.msra.mxu1 %v3638_v30 }
 0x232   :  { %1151 = vmatprep.subr.bf16.mxu0 %v3614_v26  ;;  %1192 = vmatprep.subr.bf16.mxu1 %v3644_v31 }
 0x235   :  { %1152 = vmatpush1.bf16.msra.mxu0 %v3632_v29  ;;  %1193 = vmatpush1.bf16.msra.mxu1 %v3652_v32 }
 0x236   :  { %1447 = vmatprep.subr.bf16.mxu0 %v3823_v44  ;;  %1488 = vmatprep.subr.bf16.mxu1 %v3828_v45 }
 0x2d8   :  { %v861_v3 = vpop.f32.mrf.mxu0  ;;  %v902_v4 = vpop.f32.mrf.mxu1 }
 0x2d9   :  { %v909_v7 = vadd.f32 %v2879_v2, %v861_v3  ;;  %v911_v22 = vadd.f32 %v2881_v19, %v902_v4  ;;  %v3989_v2 = vld [vmem:[%s4319_s1 + $0x4] ss:$16 sps:$4 sm:$0xff]   ;;  %v3994_v3 = vld [vmem:[%s4319_s1 + $0xc] ss:$16 sps:$4 sm:$0xff]   ;;  %v4001_v4 = vld [vmem:[%s4319_s1] ss:$16 sps:$4 sm:$0xff]  }
 0x2da   :  { %v863_v8 = vpop.f32.mrf.mxu0  ;;  %v904_v9 = vpop.f32.mrf.mxu1 }
 0x2db   :  { %v2915_v10 = vmul.f32 -1.442695, %v909_v7  ;;  %v910_v11 = vadd.f32 %v2880_v5, %v863_v8  ;;  %v912_v18 = vadd.f32 %v2882_v17, %v904_v9  ;;  %v4006_v5 = vld [vmem:[%s4319_s1 + $0x8] ss:$16 sps:$4 sm:$0xff]   ;;  %v2919_v7 = vld [vmem:[%s4320_s0 + $0x60] sm:$0xff] }
 0x2dc   :  { %v865_v12 = vpop.f32.mrf.mxu0  ;;  %v906_v13 = vpop.f32.mrf.mxu1 }
 0x2dd   :  { %3336 = vpow2.f32 %v2915_v10  ;;  %v2916_v14 = vmul.f32 -1.442695, %v910_v11  ;;  %v2917_v20 = vmul.f32 -1.442695, %v912_v18  ;;  %v2920_v10 = vld [vmem:[%s4320_s0 + $0x68] sm:$0xff] }
 0x2de   :  { %v866_v15 = vpop.f32.mrf.mxu0  ;;  %v907_v16 = vpop.f32.mrf.mxu1 }
 0x2df   :  { %3338 = vpow2.f32 %v2916_v14 }
 0x2e0   :  { %3340 = vpow2.f32 %v2917_v20 }
 0x2ea   :  { %v3337_v21 = vpop.eup %3336 }
 0x2eb   :  { %v916_v23 = vadd.f32 1.0, %v3337_v21  ;;  %v2922_v21 = vld [vmem:[%s4320_s0 + $0x78] sm:$0xff] }
 0x2ec   :  { %v3339_v24 = vpop.eup %3338 }
 0x2ed   :  { %3342 = vrcp.f32 %v916_v23  ;;  %v922_v25 = vadd.f32 1.0, %v3339_v24  ;;  %v3341_v26 = vpop.eup %3340  ;;  %v2921_v23 = vld [vmem:[%s4320_s0 + $0x70] sm:$0xff] }
 0x2ee   :  { %3344 = vtanh.f32 %v911_v22  ;;  %v929_v30 = vadd.f32 1.0, %v3341_v26 }
 0x2ef   :  { %3346 = vrcp.f32 %v922_v25 }
 0x2f0   :  { %3348 = vrcp.f32 %v929_v30 }
 0x2fa   :  { %v3343_v27 = vpop.eup %3342 }
 0x2fb   :  { %v3345_v28 = vpop.eup %3344 }
 0x2fc   :  { %v3347_v29 = vpop.eup %3346  ;;  %v933_v31 = vmul.f32 %v3345_v28, %v3343_v27 }
 0x2fd   :  { %v932_v32 = vmul.f32 %v3347_v29, %v3761_v35  ;;  %v3349_v40 = vpop.eup %3348  ;;  %v3958_v35 = vld [vmem:[%s4319_s1 + $0x48] ss:$16 sps:$4 sm:$0xff]  }
 0x2ff   :  { %v3812_v63 = vadd.f32 %v933_v31, %v932_v32 }
 0x301   :  { %3350 = vtanh.f32 %v3812_v63 }
 0x30e   :  { %v3351_v41 = vpop.eup %3350 }
 0x30f   :  { %v936_v42 = vmul.f32 %v3351_v41, %v3349_v40 }
 0x311   :  { %v937_v43 = vpack.c.bf16 %v936_v42, %v936_v42 }
 0x313   :  { %2918 = vst [vmem:[%s4321_s2 + $0x8] sm:$0xf] %v937_v43  ;;  %1170 = vmatmul.mubr.bf16.vlgmr.msra.gmra.mxu0 %v937_v43  ;;  %1211 = vmatmul.mubr.bf16.vlgmr.msra.gmra.mxu1 %v937_v43 }
 0x314   :  { %1479 = vmatprep.mubr.bf16.mxu0 %v3448_v1  ;;  %1520 = vmatprep.mubr.bf16.mxu1 %v3448_v1 }
 0x315   :  { %1448 = vmatpush1.bf16.msra.mxu0 %v3833_v46  ;;  %1489 = vmatpush1.bf16.msra.mxu1 %v3838_v47 }
 0x316   :  { %1449 = vmatprep.subr.bf16.mxu0 %v3847_v0  ;;  %1490 = vmatprep.subr.bf16.mxu1 %v3852_v6 }
 0x319   :  { %1450 = vmatpush1.bf16.msra.mxu0 %v3857_v48  ;;  %1491 = vmatpush1.bf16.msra.mxu1 %v3862_v49 }
 0x31a   :  { %1451 = vmatprep.subr.bf16.mxu0 %v3871_v50  ;;  %1492 = vmatprep.subr.bf16.mxu1 %v3876_v51 }
 0x31d   :  { %1452 = vmatpush1.bf16.msra.mxu0 %v3881_v52  ;;  %1493 = vmatpush1.bf16.msra.mxu1 %v3886_v53 }
 0x31e   :  { %1453 = vmatprep.subr.bf16.mxu0 %v3895_v54  ;;  %1494 = vmatprep.subr.bf16.mxu1 %v3900_v55 }
 0x321   :  { %1454 = vmatpush1.bf16.msra.mxu0 %v3905_v56  ;;  %1495 = vmatpush1.bf16.msra.mxu1 %v3910_v57 }
 0x322   :  { %1455 = vmatprep.subr.bf16.mxu0 %v3917_v58  ;;  %1496 = vmatprep.subr.bf16.mxu1 %v3922_v59 }
 0x325   :  { %1456 = vmatpush1.bf16.msra.mxu0 %v3929_v60  ;;  %1497 = vmatpush1.bf16.msra.mxu1 %v3934_v61 }
 0x326   :  { %1457 = vmatprep.subr.bf16.mxu0 %v3941_v62  ;;  %1498 = vmatprep.subr.bf16.mxu1 %v3946_v33 }
 0x329   :  { %1458 = vmatpush1.bf16.msra.mxu0 %v3953_v34  ;;  %1499 = vmatpush1.bf16.msra.mxu1 %v3958_v35 }
 0x32a   :  { %1459 = vmatprep.subr.bf16.mxu0 %v3965_v36  ;;  %1500 = vmatprep.subr.bf16.mxu1 %v3970_v37 }
 0x32d   :  { %1460 = vmatpush1.bf16.msra.mxu0 %v3977_v38  ;;  %1501 = vmatpush1.bf16.msra.mxu1 %v3982_v39 }
 0x32e   :  { %1461 = vmatprep.subr.bf16.mxu0 %v3989_v2  ;;  %1502 = vmatprep.subr.bf16.mxu1 %v3994_v3 }
 0x331   :  { %1462 = vmatpush1.bf16.msra.mxu0 %v4001_v4  ;;  %1503 = vmatpush1.bf16.msra.mxu1 %v4006_v5 }
 0x332   :  { %1757 = vmatprep.subr.bf16.mxu0 %v3823_v44  ;;  %1798 = vmatprep.subr.bf16.mxu1 %v3828_v45 }
 0x3d3   :  { %v1171_v8 = vpop.f32.mrf.mxu0  ;;  %v1212_v9 = vpop.f32.mrf.mxu1 }
 0x3d4   :  { %v1219_v11 = vadd.f32 %v2919_v7, %v1171_v8  ;;  %v1221_v26 = vadd.f32 %v2921_v23, %v1212_v9 }
 0x3d5   :  { %v1173_v12 = vpop.f32.mrf.mxu0  ;;  %v1214_v13 = vpop.f32.mrf.mxu1 }
 0x3d6   :  { %v2955_v14 = vmul.f32 -1.442695, %v1219_v11  ;;  %v1220_v15 = vadd.f32 %v2920_v10, %v1173_v12  ;;  %v1222_v22 = vadd.f32 %v2922_v21, %v1214_v13 }
 0x3d7   :  { %v1175_v16 = vpop.f32.mrf.mxu0  ;;  %v1216_v17 = vpop.f32.mrf.mxu1 }
 0x3d8   :  { %3352 = vpow2.f32 %v2955_v14  ;;  %v2956_v18 = vmul.f32 -1.442695, %v1220_v15  ;;  %v2957_v24 = vmul.f32 -1.442695, %v1222_v22  ;;  %v2960_v14 = vld [vmem:[%s4320_s0 + $0x88] sm:$0xff] }
 0x3d9   :  { %v1176_v19 = vpop.f32.mrf.mxu0  ;;  %v1217_v20 = vpop.f32.mrf.mxu1 }
 0x3da   :  { %3354 = vpow2.f32 %v2956_v18 }
 0x3db   :  { %3356 = vpow2.f32 %v2957_v24 }
 0x3e5   :  { %v3353_v25 = vpop.eup %3352 }
 0x3e6   :  { %v1226_v27 = vadd.f32 1.0, %v3353_v25  ;;  %v2962_v25 = vld [vmem:[%s4320_s0 + $0x98] sm:$0xff] }
 0x3e7   :  { %v3355_v28 = vpop.eup %3354 }
 0x3e8   :  { %3358 = vrcp.f32 %v1226_v27  ;;  %v1232_v29 = vadd.f32 1.0, %v3355_v28  ;;  %v3357_v30 = vpop.eup %3356  ;;  %v2961_v27 = vld [vmem:[%s4320_s0 + $0x90] sm:$0xff] }
 0x3e9   :  { %3360 = vtanh.f32 %v1221_v26  ;;  %v1239_v41 = vadd.f32 1.0, %v3357_v30 }
 0x3ea   :  { %3362 = vrcp.f32 %v1232_v29 }
 0x3eb   :  { %3364 = vrcp.f32 %v1239_v41 }
 0x3f5   :  { %v3359_v31 = vpop.eup %3358 }
 0x3f6   :  { %v3361_v32 = vpop.eup %3360 }
 0x3f7   :  { %v3363_v40 = vpop.eup %3362  ;;  %v1243_v42 = vmul.f32 %v3361_v32, %v3359_v31 }
 0x3f8   :  { %v1242_v43 = vmul.f32 %v3363_v40, %v3812_v63  ;;  %v3365_v8 = vpop.eup %3364  ;;  %v2959_v63 = vld [vmem:[%s4320_s0 + $0x80] sm:$0xff] }
 0x3fa   :  { %v4027_v7 = vadd.f32 %v1243_v42, %v1242_v43 }
 0x3fc   :  { %3366 = vtanh.f32 %v4027_v7 }
 0x409   :  { %v3367_v9 = vpop.eup %3366 }
 0x40a   :  { %v1246_v10 = vmul.f32 %v3367_v9, %v3365_v8 }
 0x40c   :  { %v1247_v11 = vpack.c.bf16 %v1246_v10, %v1246_v10 }
 0x40e   :  { %2958 = vst [vmem:[%s4321_s2 + $0xc] sm:$0xf] %v1247_v11  ;;  %1480 = vmatmul.mubr.bf16.vlgmr.msra.gmra.mxu0 %v1247_v11  ;;  %1521 = vmatmul.mubr.bf16.vlgmr.msra.gmra.mxu1 %v1247_v11 }
 0x40f   :  { %1758 = vmatpush1.bf16.msra.mxu0 %v3833_v46  ;;  %1799 = vmatpush1.bf16.msra.mxu1 %v3838_v47 }
 0x410   :  { %1759 = vmatprep.subr.bf16.mxu0 %v3847_v0  ;;  %1800 = vmatprep.subr.bf16.mxu1 %v3852_v6 }
 0x411   :  { %1789 = vmatprep.mubr.bf16.mxu0 %v3448_v1  ;;  %1830 = vmatprep.mubr.bf16.mxu1 %v3448_v1 }
 0x413   :  { %1760 = vmatpush1.bf16.msra.mxu0 %v3857_v48  ;;  %1801 = vmatpush1.bf16.msra.mxu1 %v3862_v49 }
 0x414   :  { %1761 = vmatprep.subr.bf16.mxu0 %v3871_v50  ;;  %1802 = vmatprep.subr.bf16.mxu1 %v3876_v51 }
 0x417   :  { %1762 = vmatpush1.bf16.msra.mxu0 %v3881_v52  ;;  %1803 = vmatpush1.bf16.msra.mxu1 %v3886_v53 }
 0x418   :  { %1763 = vmatprep.subr.bf16.mxu0 %v3895_v54  ;;  %1804 = vmatprep.subr.bf16.mxu1 %v3900_v55 }
 0x41b   :  { %1764 = vmatpush1.bf16.msra.mxu0 %v3905_v56  ;;  %1805 = vmatpush1.bf16.msra.mxu1 %v3910_v57 }
 0x41c   :  { %1765 = vmatprep.subr.bf16.mxu0 %v3917_v58  ;;  %1806 = vmatprep.subr.bf16.mxu1 %v3922_v59 }
 0x41f   :  { %1766 = vmatpush1.bf16.msra.mxu0 %v3929_v60  ;;  %1807 = vmatpush1.bf16.msra.mxu1 %v3934_v61 }
 0x420   :  { %1767 = vmatprep.subr.bf16.mxu0 %v3941_v62  ;;  %1808 = vmatprep.subr.bf16.mxu1 %v3946_v33 }
 0x423   :  { %1768 = vmatpush1.bf16.msra.mxu0 %v3953_v34  ;;  %1809 = vmatpush1.bf16.msra.mxu1 %v3958_v35 }
 0x424   :  { %1769 = vmatprep.subr.bf16.mxu0 %v3965_v36  ;;  %1810 = vmatprep.subr.bf16.mxu1 %v3970_v37 }
 0x427   :  { %1770 = vmatpush1.bf16.msra.mxu0 %v3977_v38  ;;  %1811 = vmatpush1.bf16.msra.mxu1 %v3982_v39 }
 0x428   :  { %1771 = vmatprep.subr.bf16.mxu0 %v3989_v2  ;;  %1812 = vmatprep.subr.bf16.mxu1 %v3994_v3 }
 0x42b   :  { %1772 = vmatpush1.bf16.msra.mxu0 %v4001_v4  ;;  %1813 = vmatpush1.bf16.msra.mxu1 %v4006_v5 }
 0x42c   :  { %2067 = vmatprep.subr.bf16.mxu0 %v3823_v44  ;;  %2108 = vmatprep.subr.bf16.mxu1 %v3828_v45 }
 0x4ce   :  { %v1481_v12 = vpop.f32.mrf.mxu0  ;;  %v1522_v13 = vpop.f32.mrf.mxu1 }
 0x4cf   :  { %v1529_v15 = vadd.f32 %v2959_v63, %v1481_v12  ;;  %v1531_v30 = vadd.f32 %v2961_v27, %v1522_v13  ;;  %v3002_v27 = vld [vmem:[%s4320_s0 + $0xb8] sm:$0xff] }
 0x4d0   :  { %v1483_v16 = vpop.f32.mrf.mxu0  ;;  %v1524_v17 = vpop.f32.mrf.mxu1 }
 0x4d1   :  { %v2995_v18 = vmul.f32 -1.442695, %v1529_v15  ;;  %v1530_v19 = vadd.f32 %v2960_v14, %v1483_v16  ;;  %v1532_v26 = vadd.f32 %v2962_v25, %v1524_v17 }
 0x4d2   :  { %v1485_v20 = vpop.f32.mrf.mxu0  ;;  %v1526_v21 = vpop.f32.mrf.mxu1 }
 0x4d3   :  { %3368 = vpow2.f32 %v2995_v18  ;;  %v2996_v22 = vmul.f32 -1.442695, %v1530_v19  ;;  %v2997_v28 = vmul.f32 -1.442695, %v1532_v26  ;;  %v3000_v18 = vld [vmem:[%s4320_s0 + $0xa8] sm:$0xff] }
 0x4d4   :  { %v1486_v23 = vpop.f32.mrf.mxu0  ;;  %v1527_v24 = vpop.f32.mrf.mxu1 }
 0x4d5   :  { %3370 = vpow2.f32 %v2996_v22 }
 0x4d6   :  { %3372 = vpow2.f32 %v2997_v28 }
 0x4e0   :  { %v3369_v29 = vpop.eup %3368 }
 0x4e1   :  { %v1536_v31 = vadd.f32 1.0, %v3369_v29  ;;  %v3001_v29 = vld [vmem:[%s4320_s0 + $0xb0] sm:$0xff] }
 0x4e2   :  { %v3371_v32 = vpop.eup %3370 }
 0x4e3   :  { %3374 = vrcp.f32 %v1536_v31  ;;  %v1542_v40 = vadd.f32 1.0, %v3371_v32  ;;  %v3373_v41 = vpop.eup %3372 }
 0x4e4   :  { %3376 = vtanh.f32 %v1531_v30  ;;  %v1549_v9 = vadd.f32 1.0, %v3373_v41 }
 0x4e5   :  { %3378 = vrcp.f32 %v1542_v40 }
 0x4e6   :  { %3380 = vrcp.f32 %v1549_v9 }
 0x4f0   :  { %v3375_v42 = vpop.eup %3374 }
 0x4f1   :  { %v3377_v43 = vpop.eup %3376 }
 0x4f2   :  { %v3379_v8 = vpop.eup %3378  ;;  %v1553_v10 = vmul.f32 %v3377_v43, %v3375_v42 }
 0x4f3   :  { %v1552_v11 = vmul.f32 %v3379_v8, %v4027_v7  ;;  %v3381_v12 = vpop.eup %3380  ;;  %v2999_v7 = vld [vmem:[%s4320_s0 + $0xa0] sm:$0xff] }
 0x4f5   :  { %v4080_v63 = vadd.f32 %v1553_v10, %v1552_v11 }
 0x4f7   :  { %3382 = vtanh.f32 %v4080_v63 }
 0x504   :  { %v3383_v13 = vpop.eup %3382 }
 0x505   :  { %v1556_v14 = vmul.f32 %v3383_v13, %v3381_v12 }
 0x507   :  { %v1557_v15 = vpack.c.bf16 %v1556_v14, %v1556_v14 }
 0x509   :  { %2998 = vst [vmem:[%s4321_s2 + $0x10] sm:$0xf] %v1557_v15  ;;  %1790 = vmatmul.mubr.bf16.vlgmr.msra.gmra.mxu0 %v1557_v15  ;;  %1831 = vmatmul.mubr.bf16.vlgmr.msra.gmra.mxu1 %v1557_v15 }
 0x50a   :  { %2068 = vmatpush1.bf16.msra.mxu0 %v3833_v46  ;;  %2109 = vmatpush1.bf16.msra.mxu1 %v3838_v47 }
 0x50b   :  { %2069 = vmatprep.subr.bf16.mxu0 %v3847_v0  ;;  %2110 = vmatprep.subr.bf16.mxu1 %v3852_v6 }
 0x50c   :  { %2099 = vmatprep.mubr.bf16.mxu0 %v3448_v1  ;;  %2140 = vmatprep.mubr.bf16.mxu1 %v3448_v1 }
 0x50e   :  { %2070 = vmatpush1.bf16.msra.mxu0 %v3857_v48  ;;  %2111 = vmatpush1.bf16.msra.mxu1 %v3862_v49 }
 0x50f   :  { %2071 = vmatprep.subr.bf16.mxu0 %v3871_v50  ;;  %2112 = vmatprep.subr.bf16.mxu1 %v3876_v51 }
 0x512   :  { %2072 = vmatpush1.bf16.msra.mxu0 %v3881_v52  ;;  %2113 = vmatpush1.bf16.msra.mxu1 %v3886_v53 }
 0x513   :  { %2073 = vmatprep.subr.bf16.mxu0 %v3895_v54  ;;  %2114 = vmatprep.subr.bf16.mxu1 %v3900_v55 }
 0x516   :  { %2074 = vmatpush1.bf16.msra.mxu0 %v3905_v56  ;;  %2115 = vmatpush1.bf16.msra.mxu1 %v3910_v57 }
 0x517   :  { %2075 = vmatprep.subr.bf16.mxu0 %v3917_v58  ;;  %2116 = vmatprep.subr.bf16.mxu1 %v3922_v59 }
 0x51a   :  { %2076 = vmatpush1.bf16.msra.mxu0 %v3929_v60  ;;  %2117 = vmatpush1.bf16.msra.mxu1 %v3934_v61 }
 0x51b   :  { %2077 = vmatprep.subr.bf16.mxu0 %v3941_v62  ;;  %2118 = vmatprep.subr.bf16.mxu1 %v3946_v33 }
 0x51e   :  { %2078 = vmatpush1.bf16.msra.mxu0 %v3953_v34  ;;  %2119 = vmatpush1.bf16.msra.mxu1 %v3958_v35 }
 0x51f   :  { %2079 = vmatprep.subr.bf16.mxu0 %v3965_v36  ;;  %2120 = vmatprep.subr.bf16.mxu1 %v3970_v37 }
 0x522   :  { %2080 = vmatpush1.bf16.msra.mxu0 %v3977_v38  ;;  %2121 = vmatpush1.bf16.msra.mxu1 %v3982_v39 }
 0x523   :  { %2081 = vmatprep.subr.bf16.mxu0 %v3989_v2  ;;  %2122 = vmatprep.subr.bf16.mxu1 %v3994_v3 }
 0x526   :  { %2082 = vmatpush1.bf16.msra.mxu0 %v4001_v4  ;;  %2123 = vmatpush1.bf16.msra.mxu1 %v4006_v5 }
 0x527   :  { %2377 = vmatprep.subr.bf16.mxu0 %v3823_v44  ;;  %2418 = vmatprep.subr.bf16.mxu1 %v3828_v45 }
 0x5c9   :  { %v1791_v16 = vpop.f32.mrf.mxu0  ;;  %v1832_v17 = vpop.f32.mrf.mxu1 }
 0x5ca   :  { %v1839_v19 = vadd.f32 %v2999_v7, %v1791_v16  ;;  %v1841_v32 = vadd.f32 %v3001_v29, %v1832_v17  ;;  %v3268_v29 = vld [vmem:[%s4319_s1 + $0xa0] ss:$16 sps:$4 sm:$0xff]  }
 0x5cb   :  { %v1793_v20 = vpop.f32.mrf.mxu0  ;;  %v1834_v21 = vpop.f32.mrf.mxu1 }
 0x5cc   :  { %v3035_v22 = vmul.f32 -1.442695, %v1839_v19  ;;  %v1840_v23 = vadd.f32 %v3000_v18, %v1793_v20  ;;  %v1842_v28 = vadd.f32 %v3002_v27, %v1834_v21  ;;  %v3270_v27 = vld [vmem:[%s4319_s1 + $0xa4] ss:$16 sps:$4 sm:$0xff]  }
 0x5cd   :  { %v1795_v24 = vpop.f32.mrf.mxu0  ;;  %v1836_v25 = vpop.f32.mrf.mxu1 }
 0x5ce   :  { %3384 = vpow2.f32 %v3035_v22  ;;  %v3036_v44 = vmul.f32 -1.442695, %v1840_v23  ;;  %v3037_v30 = vmul.f32 -1.442695, %v1842_v28  ;;  %v3258_v22 = vld [vmem:[%s4319_s1 + $0xe4] ss:$16 sps:$4 sm:$0xff]  }
 0x5cf   :  { %v1796_v45 = vpop.f32.mrf.mxu0  ;;  %v1837_v26 = vpop.f32.mrf.mxu1  ;;  %v3261_v23 = vld [vmem:[%s4319_s1 + $0xec] ss:$16 sps:$4 sm:$0xff]   ;;  %v3256_v24 = vld [vmem:[%s4319_s1 + $0xe0] ss:$16 sps:$4 sm:$0xff]   ;;  %v3259_v25 = vld [vmem:[%s4319_s1 + $0xe8] ss:$16 sps:$4 sm:$0xff]  }
 0x5d0   :  { %3386 = vpow2.f32 %v3036_v44  ;;  %v3267_v44 = vld [vmem:[%s4319_s1 + $0xcc] ss:$16 sps:$4 sm:$0xff]   ;;  %v3262_v45 = vld [vmem:[%s4319_s1 + $0xc0] ss:$16 sps:$4 sm:$0xff]   ;;  %v3265_v26 = vld [vmem:[%s4319_s1 + $0xc8] ss:$16 sps:$4 sm:$0xff]  }
 0x5d1   :  { %3388 = vpow2.f32 %v3037_v30  ;;  %v3273_v28 = vld [vmem:[%s4319_s1 + $0xac] ss:$16 sps:$4 sm:$0xff]   ;;  %v3271_v30 = vld [vmem:[%s4319_s1 + $0xa8] ss:$16 sps:$4 sm:$0xff]  }
 0x5db   :  { %v3385_v31 = vpop.eup %3384 }
 0x5dc   :  { %v1846_v40 = vadd.f32 1.0, %v3385_v31  ;;  %v3276_v31 = vld [vmem:[%s4319_s1 + $0x84] ss:$16 sps:$4 sm:$0xff]  }
 0x5dd   :  { %v3387_v41 = vpop.eup %3386 }
 0x5de   :  { %3390 = vrcp.f32 %v1846_v40  ;;  %v1852_v42 = vadd.f32 1.0, %v3387_v41  ;;  %v3389_v43 = vpop.eup %3388  ;;  %v3274_v40 = vld [vmem:[%s4319_s1 + $0x80] ss:$16 sps:$4 sm:$0xff]   ;;  %v3277_v41 = vld [vmem:[%s4319_s1 + $0x88] ss:$16 sps:$4 sm:$0xff]  }
 0x5df   :  { %3392 = vtanh.f32 %v1841_v32  ;;  %v1859_v11 = vadd.f32 1.0, %v3389_v43  ;;  %v3279_v32 = vld [vmem:[%s4319_s1 + $0x8c] ss:$16 sps:$4 sm:$0xff]  }
 0x5e0   :  { %3394 = vrcp.f32 %v1852_v42  ;;  %v3282_v42 = vld [vmem:[%s4319_s1 + $0x64] ss:$16 sps:$4 sm:$0xff]   ;;  %v3285_v43 = vld [vmem:[%s4319_s1 + $0x6c] ss:$16 sps:$4 sm:$0xff]  }
 0x5e1   :  { %3396 = vrcp.f32 %v1859_v11  ;;  %v3291_v11 = vld [vmem:[%s4319_s1 + $0x4c] ss:$16 sps:$4 sm:$0xff]  }
 0x5eb   :  { %v3391_v8 = vpop.eup %3390 }
 0x5ec   :  { %v3393_v9 = vpop.eup %3392 }
 0x5ed   :  { %v3395_v10 = vpop.eup %3394  ;;  %v1863_v12 = vmul.f32 %v3393_v9, %v3391_v8  ;;  %v3280_v8 = vld [vmem:[%s4319_s1 + $0x60] ss:$16 sps:$4 sm:$0xff]   ;;  %v3283_v9 = vld [vmem:[%s4319_s1 + $0x68] ss:$16 sps:$4 sm:$0xff]  }
 0x5ee   :  { %v1862_v13 = vmul.f32 %v3395_v10, %v4080_v63  ;;  %v3397_v15 = vpop.eup %3396  ;;  %v3288_v10 = vld [vmem:[%s4319_s1 + $0x44] ss:$16 sps:$4 sm:$0xff]  }
 0x5f0   :  { %v4133_v14 = vadd.f32 %v1863_v12, %v1862_v13  ;;  %v3286_v12 = vld [vmem:[%s4319_s1 + $0x40] ss:$16 sps:$4 sm:$0xff]   ;;  %v3289_v13 = vld [vmem:[%s4319_s1 + $0x48] ss:$16 sps:$4 sm:$0xff]  }
 0x5f2   :  { %3398 = vtanh.f32 %v4133_v14 }
 0x5ff   :  { %v3399_v7 = vpop.eup %3398 }
 0x600   :  { %v1866_v16 = vmul.f32 %v3399_v7, %v3397_v15  ;;  %v3297_v15 = vld [vmem:[%s4319_s1 + $0x2c] ss:$16 sps:$4 sm:$0xff]   ;;  %v3292_v7 = vld [vmem:[%s4319_s1 + $0x20] ss:$16 sps:$4 sm:$0xff]  }
 0x602   :  { %v1867_v17 = vpack.c.bf16 %v1866_v16, %v1866_v16  ;;  %v3295_v16 = vld [vmem:[%s4319_s1 + $0x28] ss:$16 sps:$4 sm:$0xff]  }
 0x604   :  { %3038 = vst [vmem:[%s4321_s2 + $0x14] sm:$0xf] %v1867_v17  ;;  %2100 = vmatmul.mubr.bf16.vlgmr.msra.gmra.mxu0 %v1867_v17  ;;  %2141 = vmatmul.mubr.bf16.vlgmr.msra.gmra.mxu1 %v1867_v17  ;;  %v3300_v17 = vld [vmem:[%s4319_s1 + $0x4] ss:$16 sps:$4 sm:$0xff]  }
 0x605   :  { %2378 = vmatpush1.bf16.msra.mxu0 %v3833_v46  ;;  %2419 = vmatpush1.bf16.msra.mxu1 %v3838_v47  ;;  %v3039_v46 = vld [vmem:[%s4320_s0 + $0xc0] sm:$0xff] }
 0x606   :  { %2379 = vmatprep.subr.bf16.mxu0 %v3847_v0  ;;  %2420 = vmatprep.subr.bf16.mxu1 %v3852_v6  ;;  %v3040_v6 = vld [vmem:[%s4320_s0 + $0xc8] sm:$0xff] }
 0x607   :  { %2409 = vmatprep.mubr.bf16.mxu0 %v3448_v1  ;;  %2450 = vmatprep.mubr.bf16.mxu1 %v3448_v1 }
 0x609   :  { %2380 = vmatpush1.bf16.msra.mxu0 %v3857_v48  ;;  %2421 = vmatpush1.bf16.msra.mxu1 %v3862_v49 }
 0x60a   :  { %2381 = vmatprep.subr.bf16.mxu0 %v3871_v50  ;;  %2422 = vmatprep.subr.bf16.mxu1 %v3876_v51 }
 0x60d   :  { %2382 = vmatpush1.bf16.msra.mxu0 %v3881_v52  ;;  %2423 = vmatpush1.bf16.msra.mxu1 %v3886_v53 }
 0x60e   :  { %2383 = vmatprep.subr.bf16.mxu0 %v3895_v54  ;;  %2424 = vmatprep.subr.bf16.mxu1 %v3900_v55 }
 0x611   :  { %2384 = vmatpush1.bf16.msra.mxu0 %v3905_v56  ;;  %2425 = vmatpush1.bf16.msra.mxu1 %v3910_v57 }
 0x612   :  { %2385 = vmatprep.subr.bf16.mxu0 %v3917_v58  ;;  %2426 = vmatprep.subr.bf16.mxu1 %v3922_v59  ;;  %v3042_v58 = vld [vmem:[%s4320_s0 + $0xd8] sm:$0xff] }
 0x615   :  { %2386 = vmatpush1.bf16.msra.mxu0 %v3929_v60  ;;  %2427 = vmatpush1.bf16.msra.mxu1 %v3934_v61  ;;  %v3041_v60 = vld [vmem:[%s4320_s0 + $0xd0] sm:$0xff] }
 0x616   :  { %2387 = vmatprep.subr.bf16.mxu0 %v3941_v62  ;;  %2428 = vmatprep.subr.bf16.mxu1 %v3946_v33 }
 0x619   :  { %2388 = vmatpush1.bf16.msra.mxu0 %v3953_v34  ;;  %2429 = vmatpush1.bf16.msra.mxu1 %v3958_v35 }
 0x61a   :  { %2389 = vmatprep.subr.bf16.mxu0 %v3965_v36  ;;  %2430 = vmatprep.subr.bf16.mxu1 %v3970_v37 }
 0x61d   :  { %2390 = vmatpush1.bf16.msra.mxu0 %v3977_v38  ;;  %2431 = vmatpush1.bf16.msra.mxu1 %v3982_v39 }
 0x61e   :  { %2391 = vmatprep.subr.bf16.mxu0 %v3989_v2  ;;  %2432 = vmatprep.subr.bf16.mxu1 %v3994_v3 }
 0x621   :  { %2392 = vmatpush1.bf16.msra.mxu0 %v4001_v4  ;;  %2433 = vmatpush1.bf16.msra.mxu1 %v4006_v5 }
 0x622   :  { %2687 = vmatprep.subr.bf16.mxu0 %v3258_v22  ;;  %2728 = vmatprep.subr.bf16.mxu1 %v3261_v23 }
 0x6c4   :  { %v2101_v47 = vpop.f32.mrf.mxu0  ;;  %v2142_v0 = vpop.f32.mrf.mxu1 }
 0x6c5   :  { %v2149_v48 = vadd.f32 %v3039_v46, %v2101_v47  ;;  %v2151_v33 = vadd.f32 %v3041_v60, %v2142_v0  ;;  %v3303_v46 = vld [vmem:[%s4319_s1 + $0xc] ss:$16 sps:$4 sm:$0xff]   ;;  %v3298_v47 = vld [vmem:[%s4319_s1] ss:$16 sps:$4 sm:$0xff]   ;;  %v3301_v0 = vld [vmem:[%s4319_s1 + $0x8] ss:$16 sps:$4 sm:$0xff]  }
 0x6c6   :  { %v2103_v49 = vpop.f32.mrf.mxu0  ;;  %v2144_v50 = vpop.f32.mrf.mxu1 }
 0x6c7   :  { %v3075_v51 = vmul.f32 -1.442695, %v2149_v48  ;;  %v2150_v52 = vadd.f32 %v3040_v6, %v2103_v49  ;;  %v2152_v59 = vadd.f32 %v3042_v58, %v2144_v50  ;;  %v3079_v6 = vld [vmem:[%s4320_s0 + $0xe0] sm:$0xff]  ;;  %v3080_v50 = vld [vmem:[%s4320_s0 + $0xe8] sm:$0xff] }
 0x6c8   :  { %v2105_v53 = vpop.f32.mrf.mxu0  ;;  %v2146_v54 = vpop.f32.mrf.mxu1 }
 0x6c9   :  { %3400 = vpow2.f32 %v3075_v51  ;;  %v3076_v55 = vmul.f32 -1.442695, %v2150_v52  ;;  %v3077_v61 = vmul.f32 -1.442695, %v2152_v59 }
 0x6ca   :  { %v2106_v56 = vpop.f32.mrf.mxu0  ;;  %v2147_v57 = vpop.f32.mrf.mxu1 }
 0x6cb   :  { %3402 = vpow2.f32 %v3076_v55 }
 0x6cc   :  { %3404 = vpow2.f32 %v3077_v61  ;;  %v3082_v61 = vld [vmem:[%s4320_s0 + $0xf8] sm:$0xff] }
 0x6d6   :  { %v3401_v62 = vpop.eup %3400 }
 0x6d7   :  { %v2156_v34 = vadd.f32 1.0, %v3401_v62 }
 0x6d8   :  { %v3403_v35 = vpop.eup %3402 }
 0x6d9   :  { %3406 = vrcp.f32 %v2156_v34  ;;  %v2162_v36 = vadd.f32 1.0, %v3403_v35  ;;  %v3405_v37 = vpop.eup %3404 }
 0x6da   :  { %3408 = vtanh.f32 %v2151_v33  ;;  %v2169_v3 = vadd.f32 1.0, %v3405_v37  ;;  %v3081_v33 = vld [vmem:[%s4320_s0 + $0xf0] sm:$0xff] }
 0x6db   :  { %3410 = vrcp.f32 %v2162_v36 }
 0x6dc   :  { %3412 = vrcp.f32 %v2169_v3 }
 0x6e6   :  { %v3407_v38 = vpop.eup %3406 }
 0x6e7   :  { %v3409_v39 = vpop.eup %3408 }
 0x6e8   :  { %v3411_v2 = vpop.eup %3410  ;;  %v2173_v4 = vmul.f32 %v3409_v39, %v3407_v38 }
 0x6e9   :  { %v2172_v5 = vmul.f32 %v3411_v2, %v4133_v14  ;;  %v3413_v18 = vpop.eup %3412  ;;  %v3294_v14 = vld [vmem:[%s4319_s1 + $0x24] ss:$16 sps:$4 sm:$0xff]  }
 0x6eb   :  { %v4184_v63 = vadd.f32 %v2173_v4, %v2172_v5 }
 0x6ed   :  { %3414 = vtanh.f32 %v4184_v63 }
 0x6fa   :  { %v3415_v19 = vpop.eup %3414 }
 0x6fb   :  { %v2176_v20 = vmul.f32 %v3415_v19, %v3413_v18 }
 0x6fd   :  { %v2177_v21 = vpack.c.bf16 %v2176_v20, %v2176_v20 }
 0x6ff   :  { %3078 = vst [vmem:[%s4321_s2 + $0x18] sm:$0xf] %v2177_v21  ;;  %2410 = vmatmul.mubr.bf16.vlgmr.msra.gmra.mxu0 %v2177_v21  ;;  %2451 = vmatmul.mubr.bf16.vlgmr.msra.gmra.mxu1 %v2177_v21 }
 0x700   :  { %2719 = vmatprep.mubr.bf16.mxu0 %v3448_v1  ;;  %2760 = vmatprep.mubr.bf16.mxu1 %v3448_v1  ;;  %v3264_v1 = vld [vmem:[%s4319_s1 + $0xc4] ss:$16 sps:$4 sm:$0xff]  }
 0x701   :  { %2688 = vmatpush1.bf16.msra.mxu0 %v3256_v24  ;;  %2729 = vmatpush1.bf16.msra.mxu1 %v3259_v25 }
 0x702   :  { %2689 = vmatprep.subr.bf16.mxu0 %v3264_v1  ;;  %2730 = vmatprep.subr.bf16.mxu1 %v3267_v44  ;;  %v3119_v1 = vld [vmem:[%s4320_s0 + $0x100] sm:$0xff] }
 0x705   :  { %2690 = vmatpush1.bf16.msra.mxu0 %v3262_v45  ;;  %2731 = vmatpush1.bf16.msra.mxu1 %v3265_v26 }
 0x706   :  { %2691 = vmatprep.subr.bf16.mxu0 %v3270_v27  ;;  %2732 = vmatprep.subr.bf16.mxu1 %v3273_v28 }
 0x709   :  { %2692 = vmatpush1.bf16.msra.mxu0 %v3268_v29  ;;  %2733 = vmatpush1.bf16.msra.mxu1 %v3271_v30 }
 0x70a   :  { %2693 = vmatprep.subr.bf16.mxu0 %v3276_v31  ;;  %2734 = vmatprep.subr.bf16.mxu1 %v3279_v32 }
 0x70d   :  { %2694 = vmatpush1.bf16.msra.mxu0 %v3274_v40  ;;  %2735 = vmatpush1.bf16.msra.mxu1 %v3277_v41 }
 0x70e   :  { %2695 = vmatprep.subr.bf16.mxu0 %v3282_v42  ;;  %2736 = vmatprep.subr.bf16.mxu1 %v3285_v43  ;;  %v3122_v43 = vld [vmem:[%s4320_s0 + $0x118] sm:$0xff] }
 0x711   :  { %2696 = vmatpush1.bf16.msra.mxu0 %v3280_v8  ;;  %2737 = vmatpush1.bf16.msra.mxu1 %v3283_v9  ;;  %v3121_v9 = vld [vmem:[%s4320_s0 + $0x110] sm:$0xff] }
 0x712   :  { %2697 = vmatprep.subr.bf16.mxu0 %v3288_v10  ;;  %2738 = vmatprep.subr.bf16.mxu1 %v3291_v11 }
 0x715   :  { %2698 = vmatpush1.bf16.msra.mxu0 %v3286_v12  ;;  %2739 = vmatpush1.bf16.msra.mxu1 %v3289_v13 }
 0x716   :  { %2699 = vmatprep.subr.bf16.mxu0 %v3294_v14  ;;  %2740 = vmatprep.subr.bf16.mxu1 %v3297_v15 }
 0x719   :  { %2700 = vmatpush1.bf16.msra.mxu0 %v3292_v7  ;;  %2741 = vmatpush1.bf16.msra.mxu1 %v3295_v16 }
 0x71a   :  { %2701 = vmatprep.subr.bf16.mxu0 %v3300_v17  ;;  %2742 = vmatprep.subr.bf16.mxu1 %v3303_v46 }
 0x71d   :  { %2702 = vmatpush1.bf16.msra.mxu0 %v3298_v47  ;;  %2743 = vmatpush1.bf16.msra.mxu1 %v3301_v0 }
 0x7bf   :  { %v2411_v48 = vpop.f32.mrf.mxu0  ;;  %v2452_v49 = vpop.f32.mrf.mxu1 }
 0x7c0   :  { %v2459_v51 = vadd.f32 %v3079_v6, %v2411_v48  ;;  %v2461_v36 = vadd.f32 %v3081_v33, %v2452_v49 }
 0x7c1   :  { %v2413_v52 = vpop.f32.mrf.mxu0  ;;  %v2454_v53 = vpop.f32.mrf.mxu1 }
 0x7c2   :  { %v3115_v54 = vmul.f32 -1.442695, %v2459_v51  ;;  %v2460_v55 = vadd.f32 %v3080_v50, %v2413_v52  ;;  %v2462_v62 = vadd.f32 %v3082_v61, %v2454_v53 }
 0x7c3   :  { %v2415_v56 = vpop.f32.mrf.mxu0  ;;  %v2456_v57 = vpop.f32.mrf.mxu1 }
 0x7c4   :  { %3416 = vpow2.f32 %v3115_v54  ;;  %v3116_v58 = vmul.f32 -1.442695, %v2460_v55  ;;  %v3117_v34 = vmul.f32 -1.442695, %v2462_v62 }
 0x7c5   :  { %v2416_v59 = vpop.f32.mrf.mxu0  ;;  %v2457_v60 = vpop.f32.mrf.mxu1 }
 0x7c6   :  { %3418 = vpow2.f32 %v3116_v58 }
 0x7c7   :  { %3420 = vpow2.f32 %v3117_v34 }
 0x7d1   :  { %v3417_v35 = vpop.eup %3416 }
 0x7d2   :  { %v2466_v37 = vadd.f32 1.0, %v3417_v35 }
 0x7d3   :  { %v3419_v38 = vpop.eup %3418 }
 0x7d4   :  { %3422 = vrcp.f32 %v2466_v37  ;;  %v2472_v39 = vadd.f32 1.0, %v3419_v38  ;;  %v3421_v2 = vpop.eup %3420 }
 0x7d5   :  { %3424 = vtanh.f32 %v2461_v36  ;;  %v2479_v18 = vadd.f32 1.0, %v3421_v2 }
 0x7d6   :  { %3426 = vrcp.f32 %v2472_v39 }
 0x7d7   :  { %3428 = vrcp.f32 %v2479_v18 }
 0x7e1   :  { %v3423_v3 = vpop.eup %3422 }
 0x7e2   :  { %v3425_v4 = vpop.eup %3424 }
 0x7e3   :  { %v3427_v5 = vpop.eup %3426  ;;  %v2483_v19 = vmul.f32 %v3425_v4, %v3423_v3 }
 0x7e4   :  { %v2482_v20 = vmul.f32 %v3427_v5, %v4184_v63  ;;  %v3429_v22 = vpop.eup %3428  ;;  %v3120_v63 = vld [vmem:[%s4320_s0 + $0x108] sm:$0xff] }
 0x7e6   :  { %v2484_v21 = vadd.f32 %v2483_v19, %v2482_v20 }
 0x7e8   :  { %3430 = vtanh.f32 %v2484_v21 }
 0x7f5   :  { %v3431_v23 = vpop.eup %3430 }
 0x7f6   :  { %v2486_v24 = vmul.f32 %v3431_v23, %v3429_v22 }
 0x7f8   :  { %v2487_v25 = vpack.c.bf16 %v2486_v24, %v2486_v24 }
 0x7fa   :  { %3118 = vst [vmem:[%s4321_s2 + $0x1c] sm:$0xf] %v2487_v25  ;;  %2720 = vmatmul.mubr.bf16.vlgmr.msra.gmra.mxu0 %v2487_v25  ;;  %2761 = vmatmul.mubr.bf16.vlgmr.msra.gmra.mxu1 %v2487_v25 }
 0x8ba   :  { %v2721_v44 = vpop.f32.mrf.mxu0  ;;  %v2762_v45 = vpop.f32.mrf.mxu1 }
 0x8bb   :  { %v2769_v26 = vadd.f32 %v3119_v1, %v2721_v44  ;;  %v2771_v12 = vadd.f32 %v3121_v9, %v2762_v45 }
 0x8bc   :  { %v2723_v27 = vpop.f32.mrf.mxu0  ;;  %v2764_v28 = vpop.f32.mrf.mxu1 }
 0x8bd   :  { %v3155_v29 = vmul.f32 -1.442695, %v2769_v26  ;;  %v2770_v30 = vadd.f32 %v3120_v63, %v2723_v27  ;;  %v2772_v8 = vadd.f32 %v3122_v43, %v2764_v28 }
 0x8be   :  { %v2725_v31 = vpop.f32.mrf.mxu0  ;;  %v2766_v32 = vpop.f32.mrf.mxu1 }
 0x8bf   :  { %3432 = vpow2.f32 %v3155_v29  ;;  %v3156_v40 = vmul.f32 -1.442695, %v2770_v30  ;;  %v3157_v10 = vmul.f32 -1.442695, %v2772_v8 }
 0x8c0   :  { %v2726_v41 = vpop.f32.mrf.mxu0  ;;  %v2767_v42 = vpop.f32.mrf.mxu1 }
 0x8c1   :  { %3434 = vpow2.f32 %v3156_v40 }
 0x8c2   :  { %3436 = vpow2.f32 %v3157_v10 }
 0x8cc   :  { %v3433_v11 = vpop.eup %3432 }
 0x8cd   :  { %v2776_v13 = vadd.f32 1.0, %v3433_v11 }
 0x8ce   :  { %v3435_v14 = vpop.eup %3434 }
 0x8cf   :  { %3438 = vrcp.f32 %v2776_v13  ;;  %v2782_v15 = vadd.f32 1.0, %v3435_v14  ;;  %v3437_v7 = vpop.eup %3436 }
 0x8d0   :  { %3440 = vtanh.f32 %v2771_v12  ;;  %v2789_v47 = vadd.f32 1.0, %v3437_v7 }
 0x8d1   :  { %3442 = vrcp.f32 %v2782_v15 }
 0x8d2   :  { %3444 = vrcp.f32 %v2789_v47 }
 0x8dc   :  { %v3439_v16 = vpop.eup %3438 }
 0x8dd   :  { %v3441_v17 = vpop.eup %3440 }
 0x8de   :  { %v3443_v46 = vpop.eup %3442  ;;  %v2793_v0 = vmul.f32 %v3441_v17, %v3439_v16 }
 0x8df   :  { %v2792_v6 = vmul.f32 %v3443_v46, %v2484_v21  ;;  %v3445_v49 = vpop.eup %3444 }
 0x8e1   :  { %v2794_v48 = vadd.f32 %v2793_v0, %v2792_v6 }
 0x8e3   :  { %3446 = vtanh.f32 %v2794_v48 }
 0x8f0   :  { %v3447_v50 = vpop.eup %3446 }
 0x8f1   :  { %v2796_v51 = vmul.f32 %v3447_v50, %v3445_v49 }
 0x8f3   :  { %v2797_v52 = vpack.c.bf16 %v2796_v51, %v2796_v51 }
 0x8f5   :  { %3158 = vst [vmem:[%s4321_s2 + $0x20] sm:$0xf] %v2797_v52 }

</bundles_post_ra>
